<compile_context>
chip_gen: v6e
topology: v6e:2x2x1
jax: 0.10.0
libtpu: 0.0.40
codegen_flags: <defaults>
</compile_context>

<pallas_src>
import numpy as np
import jax
import jax.numpy as jnp
from jax.experimental import pallas as pl
from jax.experimental.pallas import tpu as pltpu


def _round_up(x, m):
    return ((x + m - 1) // m) * m


def ntm_forward_pallas(i_emb, j_emb, k_emb, params, *, tile_n=1024,
                       use_bf16=True):
    """NTM forward. i_emb/j_emb/k_emb: (N, D) already-gathered embeddings."""
    N, D = i_emb.shape
    K = params["w"].shape[1]
    C = params["u1"].shape[1]
    C3 = C ** 3
    assert tile_n % 128 == 0, "tile_n must be a multiple of 128"

    # ---- tiling: lane-dense tiles, >=2 grid steps when possible (dual TC) --
    nb = pl.cdiv(N, 128)                          # number of 128-lane columns
    tb = min(tile_n // 128, max(1, (nb + 1) // 2))
    tile = tb * 128
    grid_n = pl.cdiv(N, tile)
    n_pad = grid_n * tile

    compute_dtype = jnp.bfloat16 if use_bf16 else jnp.float32
    cbytes = jnp.dtype(compute_dtype).itemsize

    # Padded sizes so every in-kernel row slice / concat seam is tile-aligned
    # (16 covers both the f32 (8,128) and bf16 (16,128) sublane tilings).
    Dp = _round_up(D, 16)
    Kp = _round_up(K, 8)
    C3p = _round_up(C3, 8)
    R = Kp + 3 * C3p

    # ---- embeddings: (N, D) -> zero-padded (Dp, n_pad) columns -------------
    def to_cols(e):
        e_t = e.T.astype(compute_dtype)                       # (D, N)
        return jnp.pad(e_t, ((0, Dp - D), (0, n_pad - N)))

    ie_t, je_t, ke_t = to_cols(i_emb), to_cols(j_emb), to_cols(k_emb)

    # ---- merged block-diagonal weight (host side) ---------------------------
    #   rows [0:K)          cols [0:D)       : w^T                 (GCP branch)
    #   rows [Kp:Kp+C3)     cols [Dp:+D)     : (U1 gathered * wx)^T  (wx folded)
    #   rows [Kp+C3p:+C3)   cols [2Dp:+D)    : (U2 gathered)^T
    #   rows [Kp+2C3p:+C3)  cols [3Dp:+D)    : (U3 gathered)^T
    idx = np.arange(C3)
    a_idx = jnp.asarray(idx // (C * C))
    b_idx = jnp.asarray((idx // C) % C)
    c_idx = jnp.asarray(idx % C)

    fc_w = params["fc_w"].astype(jnp.float32)     # (1, K + C3); cat = (gcp, x)
    wx = fc_w[0, K:]                              # (C3,) -> folded into U1
    a1 = (params["u1"][:, a_idx] * wx[None, :]).T                 # (C3, D)
    a2 = params["u2"][:, b_idx].T                                 # (C3, D)
    a3 = params["u3"][:, c_idx].T                                 # (C3, D)

    m_big = jnp.zeros((R, 4 * Dp), jnp.float32)
    m_big = m_big.at[:K, :D].set(params["w"].T.astype(jnp.float32))
    m_big = m_big.at[Kp:Kp + C3, Dp:Dp + D].set(a1)
    m_big = m_big.at[Kp + C3p:Kp + C3p + C3, 2 * Dp:2 * Dp + D].set(a2)
    m_big = m_big.at[Kp + 2 * C3p:Kp + 2 * C3p + C3, 3 * Dp:3 * Dp + D].set(a3)
    m_big = m_big.astype(compute_dtype)

    wg_col = jnp.zeros((Kp, 1), jnp.float32).at[:K, 0].set(fc_w[0, :K])

    def ntm_kernel(ie_ref, je_ref, ke_ref, m_ref, wg_ref, out_ref):
        ie = ie_ref[...]                                      # (Dp, TN)
        je = je_ref[...]
        ke = ke_ref[...]
        # Elementwise triple product in f32 (accuracy; v5e VPU has no bf16).
        mul_ijk = (ie.astype(jnp.float32) * je.astype(jnp.float32)
                   * ke.astype(jnp.float32))
        # Single 4*Dp-deep MXU contraction covering all four branches.
        rhs = jnp.concatenate(
            [mul_ijk.astype(ie.dtype), ie, je, ke], axis=0)   # (4*Dp, TN)
        big = jnp.dot(m_ref[...], rhs,
                      preferred_element_type=jnp.float32)     # (R, TN), f32
        gcp = jnp.maximum(big[:Kp], 0.0)                      # (Kp, TN)
        x1 = big[Kp:Kp + C3p]                                 # wx pre-folded
        x2 = big[Kp + C3p:Kp + 2 * C3p]
        x3 = big[Kp + 2 * C3p:]
        # FC reduced on the (otherwise idle) XLU sublane-reduce path.
        out_ref[...] = (jnp.sum(wg_ref[...] * gcp, axis=0, keepdims=True)
                        + jnp.sum(x1 * x2 * x3, axis=0, keepdims=True))

    data_spec = pl.BlockSpec((Dp, tile), lambda i: (0, i))
    full = lambda r, c: pl.BlockSpec((r, c), lambda i: (0, 0))

    cost = pl.CostEstimate(
        flops=2 * R * 4 * Dp * n_pad + 8 * Dp * n_pad + 4 * C3p * n_pad,
        transcendentals=0,
        bytes_accessed=(3 * Dp * n_pad * cbytes          # streamed embeddings
                        + R * 4 * Dp * cbytes            # merged weight
                        + n_pad * 4),                    # output row
    )

    out_row = pl.pallas_call(
        ntm_kernel,
        out_shape=jax.ShapeDtypeStruct((1, n_pad), jnp.float32),
        grid_spec=pltpu.PrefetchScalarGridSpec(
            num_scalar_prefetch=0,
            grid=(grid_n,),
            in_specs=[
                data_spec, data_spec, data_spec,   # i/j/k embedding columns
                full(R, 4 * Dp),                   # merged block-diag weight
                full(Kp, 1),                       # FC row for the GCP branch
            ],
            out_specs=pl.BlockSpec((1, tile), lambda i: (0, i)),
        ),
        compiler_params=pltpu.CompilerParams(
            dimension_semantics=("parallel",),
            vmem_limit_bytes=32 * 1024 * 1024),
        cost_estimate=cost,
    )(ie_t, je_t, ke_t, m_big, wg_col)

    # Bias added outside the kernel (one fewer input stream per grid step).
    return (out_row[0, :N].reshape(N, 1)
            + params["fc_b"].astype(jnp.float32)).astype(jnp.float32)


# ------------------------- parameter construction ---------------------------
def xavier_uniform(key, shape):
    fan_in, fan_out = shape
    limit = float(np.sqrt(6.0 / (fan_in + fan_out)))
    return jax.random.uniform(key, shape, jnp.float32, -limit, limit)


def init_ntm_params(key, num_user, num_item, num_time, latent_dim, k, c):
    ks = jax.random.split(key, 9)
    in_features = c ** 3 + k
    bound = 1.0 / float(np.sqrt(in_features))
    return {
        "user_embeddings": xavier_uniform(ks[0], (num_user, latent_dim)),
        "item_embeddings": xavier_uniform(ks[1], (num_item, latent_dim)),
        "time_embeddings": xavier_uniform(ks[2], (num_time, latent_dim)),
        "w": jax.random.normal(ks[3], (latent_dim, k), jnp.float32),
        "u1": xavier_uniform(ks[4], (latent_dim, c)),
        "u2": xavier_uniform(ks[5], (latent_dim, c)),
        "u3": xavier_uniform(ks[6], (latent_dim, c)),
        "fc_w": jax.random.uniform(ks[7], (1, in_features), jnp.float32,
                                   -bound, bound),
        "fc_b": jax.random.uniform(ks[8], (1,), jnp.float32, -bound, bound),
    }


# ---------------------- plain-JAX reference (for checking) ------------------
def ntm_reference(i_emb, j_emb, k_emb, params):
    mul_ijk = i_emb * j_emb * k_emb
    gcp = jax.nn.relu(mul_ijk @ params["w"])
    x = jnp.einsum("ni,nj,nk->nijk", i_emb, j_emb, k_emb)
    x = jnp.einsum("nijk,ia,jb,kc->nabc", x,
                   params["u1"], params["u2"], params["u3"])
    x = x.reshape(x.shape[0], -1)
    cat = jnp.concatenate([gcp, x], axis=1)
    return cat @ params["fc_w"].T + params["fc_b"]


if __name__ == "__main__":
    num_user, num_item, num_time = 50, 40, 30
    latent_dim, k_feat, c = 32, 100, 5
    batch = 300            # ragged on purpose: pads to 512 -> 2 grid steps

    key = jax.random.PRNGKey(0)
    pkey, ikey, jkey, tkey = jax.random.split(key, 4)
    params = init_ntm_params(pkey, num_user, num_item, num_time,
                             latent_dim, k_feat, c)

    i_input = jax.random.randint(ikey, (batch,), 0, num_user)
    j_input = jax.random.randint(jkey, (batch,), 0, num_item)
    k_input = jax.random.randint(tkey, (batch,), 0, num_time)

    # Embedding gather (glue in plain JAX).
    i_emb = params["user_embeddings"][i_input]
    j_emb = params["item_embeddings"][j_input]
    k_emb = params["time_embeddings"][k_input]

    ref = ntm_reference(i_emb, j_emb, k_emb, params)

    # f32 path (exact check).
    out = ntm_forward_pallas(i_emb, j_emb, k_emb, params, use_bf16=False)
    out = jax.block_until_ready(out)
    np.testing.assert_allclose(np.asarray(out), np.asarray(ref),
                               rtol=5e-4, atol=5e-4)
    assert out.shape == (batch, 1)

    # bf16 streaming/MXU path (default), looser tolerance.
    out_bf16 = ntm_forward_pallas(i_emb, j_emb, k_emb, params, use_bf16=True)
    out_bf16 = jax.block_until_ready(out_bf16)
    np.testing.assert_allclose(np.asarray(out_bf16), np.asarray(ref),
                               rtol=5e-2, atol=5e-2)

    print("KERNEL_OK")
</pallas_src>

<mosaic_0001>
module attributes {stable_mosaic.version = 11 : i64} {
  func.func @ntm_kernel(%arg0: i32, %arg1: memref<32x256xf32, #tpu.memory_space<vmem>>, %arg2: memref<32x256xf32, #tpu.memory_space<vmem>>, %arg3: memref<32x256xf32, #tpu.memory_space<vmem>>, %arg4: memref<488x128xf32, #tpu.memory_space<vmem>>, %arg5: memref<104x1xf32, #tpu.memory_space<vmem>>, %arg6: memref<1x256xf32, #tpu.memory_space<vmem>>) attributes {dimension_semantics = [#tpu.dimension_semantics<parallel>], iteration_bounds = array<i64: 2>, scalar_prefetch = 0 : i64, scratch_operands = 0 : i64, tpu.core_type = #tpu.core_type<tc>, window_params = [{transform_indices = @transform_0, window_bounds = array<i64: 32, 256>}, {transform_indices = @transform_1, window_bounds = array<i64: 32, 256>}, {transform_indices = @transform_2, window_bounds = array<i64: 32, 256>}, {pipeline_mode = #tpu.pipeline_mode<synchronous>, transform_indices = @transform_3, window_bounds = array<i64: 488, 128>}, {pipeline_mode = #tpu.pipeline_mode<synchronous>, transform_indices = @transform_4, window_bounds = array<i64: 104, 1>}, {transform_indices = @transform_5, window_bounds = array<i64: 1, 256>}]} {
    %c0 = arith.constant 0 : index
    %c0_0 = arith.constant 0 : index
    %0 = vector.load %arg1[%c0, %c0_0] : memref<32x256xf32, #tpu.memory_space<vmem>>, vector<32x256xf32>
    %c0_1 = arith.constant 0 : index
    %c0_2 = arith.constant 0 : index
    %1 = vector.load %arg2[%c0_1, %c0_2] : memref<32x256xf32, #tpu.memory_space<vmem>>, vector<32x256xf32>
    %c0_3 = arith.constant 0 : index
    %c0_4 = arith.constant 0 : index
    %2 = vector.load %arg3[%c0_3, %c0_4] : memref<32x256xf32, #tpu.memory_space<vmem>>, vector<32x256xf32>
    %3 = arith.mulf %0, %1 : vector<32x256xf32>
    %4 = arith.mulf %3, %2 : vector<32x256xf32>
    %5 = tpu.concatenate %4, %0, %1, %2 in 0 : vector<32x256xf32>, vector<32x256xf32>, vector<32x256xf32>, vector<32x256xf32> -> vector<128x256xf32>
    %c0_5 = arith.constant 0 : index
    %c0_6 = arith.constant 0 : index
    %6 = vector.load %arg4[%c0_5, %c0_6] : memref<488x128xf32, #tpu.memory_space<vmem>>, vector<488x128xf32>
    %cst = arith.constant dense<0.000000e+00> : vector<488x256xf32>
    %7 = tpu.matmul %6, %5, %cst {dimension_numbers = #tpu.dot_dimension_numbers<[1], [0], [0], [1], [0, 0, 1, 1], [], []>} : vector<488x128xf32>, vector<128x256xf32>, vector<488x256xf32> -> vector<488x256xf32>
    %8 = vector.extract_strided_slice %7 {offsets = [0, 0], sizes = [104, 256], strides = [1, 1]} : vector<488x256xf32> to vector<104x256xf32>
    %cst_7 = arith.constant 0.000000e+00 : f32
    %9 = vector.broadcast %cst_7 : f32 to vector<104x256xf32>
    %10 = arith.maximumf %8, %9 : vector<104x256xf32>
    %11 = vector.extract_strided_slice %7 {offsets = [104, 0], sizes = [128, 256], strides = [1, 1]} : vector<488x256xf32> to vector<128x256xf32>
    %12 = vector.extract_strided_slice %7 {offsets = [232, 0], sizes = [128, 256], strides = [1, 1]} : vector<488x256xf32> to vector<128x256xf32>
    %13 = vector.extract_strided_slice %7 {offsets = [360, 0], sizes = [128, 256], strides = [1, 1]} : vector<488x256xf32> to vector<128x256xf32>
    %c0_8 = arith.constant 0 : index
    %c0_9 = arith.constant 0 : index
    %14 = vector.load %arg5[%c0_8, %c0_9] : memref<104x1xf32, #tpu.memory_space<vmem>>, vector<104x1xf32>
    %15 = vector.broadcast %14 : vector<104x1xf32> to vector<104x256xf32>
    %16 = arith.mulf %15, %10 : vector<104x256xf32>
    %cst_10 = arith.constant dense<0.000000e+00> : vector<256xf32>
    %17 = vector.multi_reduction <add>, %16, %cst_10 [0] : vector<104x256xf32> to vector<256xf32>
    %18 = vector.shape_cast %17 : vector<256xf32> to vector<1x256xf32>
    %19 = arith.mulf %11, %12 : vector<128x256xf32>
    %20 = arith.mulf %19, %13 : vector<128x256xf32>
    %cst_11 = arith.constant dense<0.000000e+00> : vector<256xf32>
    %21 = vector.multi_reduction <add>, %20, %cst_11 [0] : vector<128x256xf32> to vector<256xf32>
    %22 = vector.shape_cast %21 : vector<256xf32> to vector<1x256xf32>
    %23 = arith.addf %18, %22 : vector<1x256xf32>
    %c0_12 = arith.constant 0 : index
    %c0_13 = arith.constant 0 : index
    %24 = vector.load %arg6[%c0_12, %c0_13] : memref<1x256xf32, #tpu.memory_space<vmem>>, vector<1x256xf32>
    tpu.vector_store %arg6[%c0_12, %c0_13], %23 {strides = array<i32>} : memref<1x256xf32, #tpu.memory_space<vmem>>, vector<1x256xf32>,
    return
  }
  func.func @transform_0(%arg0: i32) -> (i32, i32) {
    %c0_i32 = arith.constant 0 : i32
    %c0_i32_0 = arith.constant 0 : i32
    return %c0_i32, %arg0 : i32, i32
  }
  func.func @transform_1(%arg0: i32) -> (i32, i32) {
    %c0_i32 = arith.constant 0 : i32
    %c0_i32_0 = arith.constant 0 : i32
    return %c0_i32, %arg0 : i32, i32
  }
  func.func @transform_2(%arg0: i32) -> (i32, i32) {
    %c0_i32 = arith.constant 0 : i32
    %c0_i32_0 = arith.constant 0 : i32
    return %c0_i32, %arg0 : i32, i32
  }
  func.func @transform_3(%arg0: i32) -> (i32, i32) {
    %c0_i32 = arith.constant 0 : i32
    %c0_i32_0 = arith.constant 0 : i32
    %c0_i32_1 = arith.constant 0 : i32
    return %c0_i32, %c0_i32_0 : i32, i32
  }
  func.func @transform_4(%arg0: i32) -> (i32, i32) {
    %c0_i32 = arith.constant 0 : i32
    %c0_i32_0 = arith.constant 0 : i32
    %c0_i32_1 = arith.constant 0 : i32
    return %c0_i32, %c0_i32_0 : i32, i32
  }
  func.func @transform_5(%arg0: i32) -> (i32, i32) {
    %c0_i32 = arith.constant 0 : i32
    %c0_i32_0 = arith.constant 0 : i32
    return %c0_i32, %arg0 : i32, i32
  }
}

</mosaic_0001>

<bundles_post_ra>
// kernel: tpu_custom_call.1
= control target key start
LH: loop header
LB: loop body
LE: loop exit
PB: predicated region body
PF: predicated region fallthrough
CT: control target
= control target key end

     0   :  { %s2314_s0 = inlined_call_operand.hbm [shape: f32[32,512], index: 0, kind: input, shape index: {}]   ;;  %s2315_s1 = inlined_call_operand.hbm [shape: f32[32,512], index: 1, kind: input, shape index: {}]   ;;  %s2316_s2 = inlined_call_operand.hbm [shape: f32[32,512], index: 2, kind: input, shape index: {}]   ;;  %s2317_s3 = inlined_call_operand.hbm [shape: f32[488,128], index: 3, kind: input, shape index: {}]   ;;  %s2318_s4 = inlined_call_operand.vmem [shape: f32[104,1], index: 4, kind: input, shape index: {}]   ;;  %s2319_s5 = inlined_call_operand.hbm [shape: f32[1,512], index: 5, kind: output, shape index: {}]  }
   0x1   :  { %2340 = sst [smem:[#allocation57_spill]] %s2315_s1 }
   0x2   :  { %2341 = sst [smem:[#allocation58_spill]] %s2319_s5 }
   0x3   :  { %10 = vsyncpa [#allocation3], 0 }
   0x4   :  { %12 = vsyncpa [#allocation3 + $0x1], 0 }
   0x5   :  { %13 = vsyncpa [#allocation6], 0 }
   0x6   :  { %15 = vsyncpa [#allocation6 + $0x1], 0 }
   0x7   :  { %16 = vsyncpa [#allocation9], 0 }
   0x8   :  { %17 = vsyncpa [#allocation4], 0 }
   0x9   :  { %19 = vsyncpa [#allocation4 + $0x1], 0  ;;  %s1670_s18 = smov 0   ;;  %s1672_s19 = smov 0  }
   0xa   :  { %s1674_s20 = smov 0   ;;  %s1676_s21 = smov 0  }
   0xb LB: > { %2342 = sst [smem:[#allocation15_spill]] %s1613_s18  ;;  %s1691_s22 = sadd.s32 1, %s1625_s21   ;;  %s1625_s21 = sphi %s1676_s21, %s2445_s21   ;;  %s1621_s20 = sphi %s1674_s20, %s2449_s20   ;;  %s1617_s19 = sphi %s1672_s19, %s2448_s19   ;;  %s1613_s18 = sphi %s1670_s18, %s2447_s18  }
   0xc   : > { %2343 = sst [smem:[#allocation16_spill]] %s1625_s21  ;;  %s32_s23 = sadd.s32 1, %s1621_s20 }
   0xd   : > { %2344 = sst [smem:[#allocation17_spill]] %s1691_s22  ;;  %s29_s24 = ssub.s32 %s1625_s21, %s1691_s22 }
   0xe   : > { %p2320_p0 = scmp.ne.s32.totalorder %s1621_s20, %s1617_s19  ;;  %p30_p1 = scmp.eq.s32.totalorder %s29_s24, 0 }
   0xf   : > { %p40_p2 = scmp.eq.s32.totalorder %s1625_s21, 0  ;;  %p1397_p4 = scmp.lt.s32.totalorder %s1625_s21, 2 }
  0x10   : > { %s1702_s25 = scalar_select %p30_p1, %s1621_s20, %s32_s23  }
  0x11   : > { %p41_p5 = por %p40_p2, %p2320_p0  ;;  %s2328_s26 = sand.u32 1, %s1621_s20  }
  0x12   : > { %2345 = sst [smem:[#allocation18_spill]] %s1702_s25  ;;  %s1710_s27 = sshll.u32 %s2328_s26, 6 }
  0x13   : > { %s1713_s28 = sshll.u32 %s1625_s21, 8  ;;  %p1715_p6 = pnand %p1397_p4, %p41_p5 }
  0x14   : > { %s226_s30 = sand.u32 1, %s1625_s21   ;;  %s2347_s1 = sld [smem:[#allocation57_spill]] }
  0x15   : > { %s230_s9 = scalar_lea.vmem [#allocation5], %s1710_s27  ;;  %s1729_s11 = scalar_lea.sflag [#allocation6], %s226_s30 }
  0x16   : > { %s237_s10 = sshll.u32 %s230_s9, 4  ;;  %p1735_p8 = pneg %p1715_p6  ;;  %s1727_s10 = int_to_ptr.vmem [resolvable:$true] %s237_s10 }
  0x1a   : > { %s1724_s8 = scalar_lea.hbm %s2347_s1, %s1713_s28  ;;  %s1448_s16 = scalar_lea.hbm %s2347_s1, 2048 }
  0x1b   : > { %s1443_s12 = scalar_lea.hbm %s1724_s8, 1024  ;;  %p1449_p11 = scmp.lt.s32.totalorder %s1724_s8, %s2347_s1 }
  0x1c   : > { %p1444_p7 = scmp.ne.s32.totalorder %s1724_s8, %s1443_s12  ;;  %p1450_p12 = scmp.lt.s32.totalorder %s1448_s16, %s1443_s12 }
  0x1e   : > { %p1446_p9 = pnand %p1735_p8, %p1444_p7  ;;  %p1451_p13 = por %p1450_p12, %p1449_p11 }
  0x20   : > { %p1447_p10 = pneg %p1446_p9 }
  0x22   : > { %p1452_p1 = pnand %p1451_p13, %p1447_p10 }
  0x24   : > { %1455 = shalt.err (!%p1452_p1)
}
  0x25   : > { %s1456_s24 = scalar_lea.vmem %s1727_s10, 1024  ;;  %s1627_s30 = smov [#allocation5]  }
  0x26   : > { %p1457_p2 = scmp.ne.s32.totalorder %s1727_s10, %s1456_s24  ;;  %s1461_s6 = sshll.u32 %s1627_s30, 4  ;;  %s1462_s6 = int_to_ptr.vmem [resolvable:$false] %s1461_s6 }
  0x27   : > { %s1463_s7 = scalar_lea.vmem %s1462_s6, 2048  ;;  %p1464_p7 = scmp.lt.s32.totalorder %s1727_s10, %s1462_s6 }
  0x28   : > { %p1459_p4 = pnand %p1457_p2, %p1735_p8  ;;  %p1465_p9 = scmp.lt.s32.totalorder %s1463_s7, %s1456_s24 }
  0x2a   : > { %p1460_p5 = pneg %p1459_p4  ;;  %p1466_p3 = por %p1465_p9, %p1464_p7 }
  0x2c   : > { %p1467_p0 = pnand %p1466_p3, %p1460_p5 }
  0x2e   : > { %1470 = shalt.err (!%p1467_p0)
}
  0x2f   : > { %s2321_s9 = smov 512   ;;  %s2323_s12 = smov 256  }
  0x30   : > { %s2325_s14 = smov 16   ;;  %s1762_s15 = sadd.s32 4294967295, %s1625_s21  }
  0x31   : > { %1388 = dma.hbm_to_vmem [thread:$0]  (!%p1715_p6), %s1724_s8, 1024, %s1727_s10, %s1729_s11, %s2321_s9, %s2323_s12, %s2325_s14  }
  0x32   : > { %s1306_s16 = sadd.s32 4294967294, %s1625_s21   ;;  %p45_p0 = scmp.ne.s32.totalorder %s1617_s19, %s1613_s18 }
  0x33   : > { %p2327_p3 = scmp.eq.s32.totalorder %s1762_s15, 0  ;;  %p163_p10 = scmp.eq.s32.totalorder %s1762_s15, 1 }
  0x34   : > { %p169_p11 = scmp.eq.s32.totalorder %s1306_s16, 1  ;;  %p1307_p12 = scmp.ge.s32.totalorder %s1625_s21, 1 }
  0x35   : > { %p1772_p13 = por %p2327_p3, %p45_p0  ;;  %p2350_p1 = scmp.ne.s32.totalorder %s1621_s20, %s1617_s19 }
  0x36   : > { %p1783_p4 = por %p169_p11, %p45_p0  ;;  %p176_p5 = scmp.lt.s32.totalorder %s1625_s21, 3 }
  0x37   : > { %s2349_s17 = scalar_select %p1772_p13, 1, 0 }
  0x38   : > { %p1779_p2 = por %p163_p10, %p2350_p1  ;;  %p1788_p7 = pnand %p1307_p12, %p176_p5 }
  0x39   : > { %s2352_s10 = scalar_select %p1783_p4, 1, 0 }
  0x3a   : > { %s2351_s8 = scalar_select %p1779_p2, 1, 0 }
  0x3b   : > { %2353 = sst [smem:[#allocation19_spill]] %s2352_s10  ;;  %s1631_s24 = smov [#allocation8]  }
  0x3c   : > { %s2354_s23 = scalar_select %p1788_p7, 1, 0 }
  0x3d   : > { %s188_s30 = sshll.u32 %s1631_s24, 4  ;;  %p1378_p9 = pneg %p1788_p7  ;;  %s189_s30 = int_to_ptr.vmem [resolvable:$true] %s188_s30 }
  0x3e   : > { %s1804_s9 = scalar_lea.hbm %s2314_s0, %s1713_s28  ;;  %s209_s12 = scalar_lea.vmem [#allocation2], %s1710_s27 }
  0x3f   : > { %p1796_p10 = pnand %p1378_p9, %p2327_p3  ;;  %s216_s14 = sshll.u32 %s209_s12, 4  ;;  %s1807_s14 = int_to_ptr.vmem [resolvable:$true] %s216_s14 }
  0x40   : > { %s1482_s24 = scalar_lea.vmem %s189_s30, 7808  ;;  %p1490_p5 = scmp.lt.s32.totalorder %s189_s30, %s189_s30 }
  0x41   : > { %p1473_p0 = pneg %p1796_p10  ;;  %p1483_p11 = scmp.ne.s32.totalorder %s189_s30, %s1482_s24 }
  0x42   : > { %p1491_p9 = scmp.lt.s32.totalorder %s1482_s24, %s1482_s24 }
  0x43   : > { %p1485_p12 = pnand %p1483_p11, %p1473_p0 }
  0x44   : > { %p1492_p3 = por %p1491_p9, %p1490_p5 }
  0x45   : > { %p1486_p1 = pneg %p1485_p12 }
  0x47   : > { %p1493_p4 = pnand %p1492_p3, %p1486_p1 }
  0x49   : > { %1496 = shalt.err (!%p1493_p4)
}
  0x4a   : > { %s1632_s26 = smov 128   ;;  %s1633_s12 = smov 8  }
  0x4b   : > { %1381 = dma.hbm_to_vmem [thread:$0]  (!%p1796_p10), %s2317_s3, 7808, %s189_s30, [#allocation9], %s1632_s26, %s1632_s26, %s1633_s12  }
  0x4c   : > { %s2356_s1 = sand.u32 1, %s1621_s20   ;;  %s1497_s22 = scalar_lea.hbm %s1804_s9, 1024 }
  0x4d   : > { %s206_s25 = scalar_lea.sflag [#allocation3], %s2356_s1  ;;  %p1498_p0 = scmp.ne.s32.totalorder %s1804_s9, %s1497_s22 }
  0x4e   : > { %s1502_s10 = scalar_lea.hbm %s2314_s0, 2048  ;;  %p1503_p11 = scmp.lt.s32.totalorder %s1804_s9, %s2314_s0 }
  0x4f   : > { %p1500_p3 = pnand %p1498_p0, %p1735_p8  ;;  %p1504_p12 = scmp.lt.s32.totalorder %s1502_s10, %s1497_s22 }
  0x51   : > { %p1501_p4 = pneg %p1500_p3  ;;  %p1505_p1 = por %p1504_p12, %p1503_p11 }
  0x53   : > { %p1506_p5 = pnand %p1505_p1, %p1501_p4 }
  0x55   : > { %1509 = shalt.err (!%p1506_p5)
}
  0x56   : > { %s1510_s1 = scalar_lea.vmem %s1807_s14, 1024  ;;  %s1634_s26 = smov [#allocation2]  }
  0x57   : > { %p1511_p10 = scmp.ne.s32.totalorder %s1807_s14, %s1510_s1  ;;  %s1515_s21 = sshll.u32 %s1634_s26, 4  ;;  %s1516_s21 = int_to_ptr.vmem [resolvable:$false] %s1515_s21 }
  0x58   : > { %s1517_s30 = scalar_lea.vmem %s1516_s21, 2048  ;;  %p1518_p3 = scmp.lt.s32.totalorder %s1807_s14, %s1516_s21 }
  0x59   : > { %p1513_p9 = pnand %p1511_p10, %p1735_p8  ;;  %p1519_p2 = scmp.lt.s32.totalorder %s1517_s30, %s1510_s1 }
  0x5b   : > { %p1514_p0 = pneg %p1513_p9  ;;  %p1520_p13 = por %p1519_p2, %p1518_p3 }
  0x5d   : > { %p1521_p7 = pnand %p1520_p13, %p1514_p0 }
  0x5f   : > { %1524 = shalt.err (!%p1521_p7)
}
  0x60   : > { %s2357_s5 = smov 16   ;;  %s2358_s18 = smov 256  }
  0x61   : > { %s2359_s22 = smov 512   ;;  %s1845_s12 = scalar_lea.hbm %s2316_s2, %s1713_s28 }
  0x62   : > { %1385 = dma.hbm_to_vmem [thread:$0]  (!%p1715_p6), %s1804_s9, 1024, %s1807_s14, %s206_s25, %s2359_s22, %s2358_s18, %s2357_s5  }
  0x63   : > { %s251_s7 = scalar_lea.vmem [#allocation7], %s1710_s27  ;;  %s1525_s24 = scalar_lea.hbm %s1845_s12, 1024 }
  0x64   : > { %s258_s16 = sshll.u32 %s251_s7, 4  ;;  %p1526_p13 = scmp.ne.s32.totalorder %s1845_s12, %s1525_s24  ;;  %s259_s16 = int_to_ptr.vmem [resolvable:$true] %s258_s16 }
  0x65   : > { %s1530_s25 = scalar_lea.hbm %s2316_s2, 2048  ;;  %p1531_p4 = scmp.lt.s32.totalorder %s1845_s12, %s2316_s2 }
  0x66   : > { %p1528_p2 = pnand %p1526_p13, %p1735_p8  ;;  %p1532_p11 = scmp.lt.s32.totalorder %s1530_s25, %s1525_s24 }
  0x68   : > { %p1529_p7 = pneg %p1528_p2  ;;  %p1533_p12 = por %p1532_p11, %p1531_p4 }
  0x6a   : > { %p1534_p1 = pnand %p1533_p12, %p1529_p7 }
  0x6c   : > { %1537 = shalt.err (!%p1534_p1)
}
  0x6d   : > { %s1538_s27 = scalar_lea.vmem %s259_s16, 1024  ;;  %s1635_s28 = smov [#allocation7]  }
  0x6e   : > { %p1539_p5 = scmp.ne.s32.totalorder %s259_s16, %s1538_s27  ;;  %s1543_s21 = sshll.u32 %s1635_s28, 4  ;;  %s1544_s21 = int_to_ptr.vmem [resolvable:$false] %s1543_s21 }
  0x6f   : > { %s1545_s30 = scalar_lea.vmem %s1544_s21, 2048  ;;  %p1546_p0 = scmp.lt.s32.totalorder %s259_s16, %s1544_s21 }
  0x70   : > { %p1541_p10 = pnand %p1539_p5, %p1735_p8  ;;  %p1547_p3 = scmp.lt.s32.totalorder %s1545_s30, %s1538_s27 }
  0x72   : > { %p1542_p9 = pneg %p1541_p10  ;;  %p1548_p13 = por %p1547_p3, %p1546_p0 }
  0x74   : > { %p1549_p2 = pnand %p1548_p13, %p1542_p9 }
  0x76   : > { %1552 = shalt.err (!%p1549_p2)
}
  0x77   : > { %1391 = dma.hbm_to_vmem [thread:$0]  (!%p1715_p6), %s1845_s12, 1024, %s259_s16, %s1729_s11, %s2359_s22, %s2358_s18, %s2357_s5  }
  0x78   : > { %p2360_p8 = scmp.ne.s32.totalorder %s2354_s23, 0 }
  0x7a   : > { %270 = sbr.rel (%p2360_p8) target bundleno = 554 (0x22a), region = 40 }
  0x7f   : > { %s1871_s13 = sand.u32 1, %s1617_s19   ;;  %p2361_p7 = scmp.ne.s32.totalorder %s2349_s17, 0 }
  0x80   : > { %s1320_s10 = sshll.u32 %s1871_s13, 6  ;;  %s273_s6 = scalar_lea.sflag [#allocation3], %s1871_s13 }
  0x81   : > { %s1875_s7 = scalar_lea.vmem [#allocation2], %s1320_s10 }
  0x82   : > { %1596 = dma.done.wait (%p2361_p7), %s273_s6, 1024  }
  0x83   : > { %1598 = vsyncadd (%p2361_p7), %s273_s6, 4294966272  ;;  %s281_s29 = sand.u32 1, %s1762_s15   ;;  %s1882_s23 = scalar_lea.vmem [#allocation5], %s1320_s10 }
  0x84   : > { %s282_s11 = scalar_lea.sflag [#allocation6], %s281_s29 }
  0x85   : > { %1600 = dma.done.wait (%p2361_p7), %s282_s11, 2048  }
  0x86   : > { %1602 = vsyncadd (%p2361_p7), %s282_s11, 4294965248  ;;  %s294_s5 = scalar_lea.vmem [#allocation7], %s1320_s10  ;;  %p2362_p6 = scmp.eq.s32.totalorder %s1762_s15, 0 }
  0x88   : > { %1604 = dma.done.wait (%p2362_p6), [#allocation9], 7808   ;;  %p2363_p4 = pmov %p2362_p6 }
  0x89   : > { %v1636_v0 = vmov 0.0   ;;  %v1637_v1 = vmov 0   ;;  %v1894_v2 = vld [vmem:[%s294_s5 + $0x38] sm:$0xff]  ;;  %v1896_v3 = vld [vmem:[%s294_s5 + $0x30] sm:$0xff]  ;;  %v1898_v4 = vld [vmem:[%s294_s5 + $0x28] sm:$0xff]  ;;  %s1324_s16 = sshll.u32 %s1871_s13, 1 }
  0x8a   : > { %1606 = vsyncadd (%p2363_p4), [#allocation9], 4294959488  ;;  %504 = vmatprep.mubr.f32.mxu0 %v1636_v0  ;;  %690 = vmatprep.mubr.f32.mxu1 %v1636_v0  ;;  %v1902_v5 = vld [vmem:[%s294_s5 + $0x20] sm:$0xff]  ;;  %v1906_v6 = vld [vmem:[%s294_s5 + $0x18] sm:$0xff]  ;;  %s1333_s24 = sshll.u32 %s1762_s15, 5  ;;  %s334_s1 = scalar_lea.vmem [#allocation10], %s1324_s16 }
  0x8b   : > { %1441 = vset.pattern.permute.xlu0 %v1637_v1  ;;  %1442 = vset.pattern.permute.xlu1 %v1637_v1  ;;  %v1910_v7 = vld [vmem:[%s294_s5 + $0x10] sm:$0xff]  ;;  %v1914_v8 = vld [vmem:[%s294_s5 + $0x8] sm:$0xff]  ;;  %v1918_v9 = vld [vmem:[%s294_s5] sm:$0xff]  ;;  %s1183_s26 = sshll.u32 %s334_s1, 4  ;;  %s2438_s14 = sld [smem:[#allocation58_spill]]  ;;  %s1184_s26 = int_to_ptr.vmem [resolvable:$true] %s1183_s26 }
  0x8c   : > { %440 = vmatprep.subr.mxu0 %v1894_v2  ;;  %1334 = vmatprep.subr.mxu1 %v1894_v2  ;;  %v354_v10 = vld [vmem:[%s1882_s23 + $0x38] sm:$0xff]  ;;  %v353_v11 = vld [vmem:[%s1882_s23 + $0x30] sm:$0xff]  ;;  %v352_v12 = vld [vmem:[%s1882_s23 + $0x28] sm:$0xff]  ;;  %s1169_s28 = scalar_lea.sflag [#allocation4], %s1871_s13  ;;  %s1553_s21 = scalar_lea.vmem %s1184_s26, 32 }
  0x8d   : > { %441 = vmatpush1.msra.mxu0 %v1896_v3  ;;  %1350 = vmatpush1.msra.mxu1 %v1896_v3  ;;  %v351_v13 = vld [vmem:[%s1882_s23 + $0x20] sm:$0xff]  ;;  %v350_v14 = vld [vmem:[%s1882_s23 + $0x18] sm:$0xff]  ;;  %v349_v15 = vld [vmem:[%s1882_s23 + $0x10] sm:$0xff]  ;;  %p1554_p11 = scmp.ne.s32.totalorder %s1184_s26, %s1553_s21  ;;  %p2439_p12 = scmp.ne.s32.totalorder %s2351_s8, 0 }
  0x8e   : > { %442 = vmatprep.subr.mxu0 %v1898_v4  ;;  %1335 = vmatprep.subr.mxu1 %v1898_v4  ;;  %v348_v16 = vld [vmem:[%s1882_s23 + $0x8] sm:$0xff]  ;;  %v347_v17 = vld [vmem:[%s1882_s23] sm:$0xff]  ;;  %v346_v18 = vld [vmem:[%s1875_s7 + $0x38] sm:$0xff]  ;;  %s1639_s30 = smov [#allocation10]  }
  0x8f   : > { %443 = vmatpush1.msra.mxu0 %v1902_v5  ;;  %1351 = vmatpush1.msra.mxu1 %v1902_v5  ;;  %v345_v19 = vld [vmem:[%s1875_s7 + $0x30] sm:$0xff]  ;;  %v344_v20 = vld [vmem:[%s1875_s7 + $0x28] sm:$0xff]  ;;  %v370_v21 = vmul.f32 %v354_v10, %v346_v18  ;;  %v343_v22 = vld [vmem:[%s1875_s7 + $0x20] sm:$0xff]  ;;  %p1555_p1 = pnand %p1554_p11, %p2439_p12  ;;  %s1557_s10 = sshll.u32 %s1639_s30, 4  ;;  %s1558_s10 = int_to_ptr.vmem [resolvable:$false] %s1557_s10 }
  0x90   : > { %444 = vmatprep.subr.mxu0 %v1906_v6  ;;  %1336 = vmatprep.subr.mxu1 %v1906_v6  ;;  %v369_v23 = vmul.f32 %v353_v11, %v345_v19  ;;  %v342_v24 = vld [vmem:[%s1875_s7 + $0x18] sm:$0xff]  ;;  %v368_v25 = vmul.f32 %v352_v12, %v344_v20  ;;  %v341_v26 = vld [vmem:[%s1875_s7 + $0x10] sm:$0xff]  ;;  %v367_v27 = vmul.f32 %v351_v13, %v343_v22  ;;  %v340_v28 = vld [vmem:[%s1875_s7 + $0x8] sm:$0xff]  ;;  %s1559_s15 = scalar_lea.vmem %s1558_s10, 64  ;;  %p1560_p10 = scmp.lt.s32.totalorder %s1184_s26, %s1558_s10 }
  0x91   : > { %445 = vmatpush1.msra.mxu0 %v1910_v7  ;;  %1352 = vmatpush1.msra.mxu1 %v1910_v7  ;;  %v366_v29 = vmul.f32 %v350_v14, %v342_v24  ;;  %v339_v30 = vld [vmem:[%s1875_s7] sm:$0xff]  ;;  %v378_v31 = vmul.f32 %v370_v21, %v1894_v2  ;;  %v365_v32 = vmul.f32 %v349_v15, %v341_v26  ;;  %v410_v43 = vld [vmem:[#allocation8 + $0xf8] sm:$0xff]  ;;  %v899_v45 = vld [vmem:[%s2318_s4 + $0x10] sm:$0xff]  ;;  %s1181_s27 = scalar_lea.hbm %s2438_s14, %s1333_s24  ;;  %p1556_p5 = pneg %p1555_p1 }
  0x92   : > { %446 = vmatprep.subr.mxu0 %v1914_v8  ;;  %1337 = vmatprep.subr.mxu1 %v1914_v8  ;;  %v377_v33 = vmul.f32 %v369_v23, %v1896_v3  ;;  %v364_v34 = vmul.f32 %v348_v16, %v340_v28  ;;  %v376_v35 = vmul.f32 %v368_v25, %v1898_v4  ;;  %v379_v42 = vld [vmem:[#allocation8] sm:$0xff]  ;;  %v380_v46 = vld [vmem:[#allocation8 + $0x8] sm:$0xff]  ;;  %v900_v49 = vld [vmem:[%s2318_s4 + $0x18] sm:$0xff]  ;;  %p1561_p9 = scmp.lt.s32.totalorder %s1559_s15, %s1553_s21 }
  0x93   : > { %447 = vmatpush1.msra.mxu0 %v1918_v9  ;;  %1353 = vmatpush1.msra.mxu1 %v1918_v9  ;;  %v363_v36 = vmul.f32 %v347_v17, %v339_v30  ;;  %v375_v37 = vmul.f32 %v367_v27, %v1902_v5  ;;  %v374_v38 = vmul.f32 %v366_v29, %v1906_v6  ;;  %v897_v44 = vld [vmem:[%s2318_s4] sm:$0xff]  ;;  %v898_v48 = vld [vmem:[%s2318_s4 + $0x8] sm:$0xff]  ;;  %v381_v50 = vld [vmem:[#allocation8 + $0x10] sm:$0xff] }
  0x94   : > { %448 = vmatprep.subr.mxu0 %v354_v10  ;;  %1338 = vmatprep.subr.mxu1 %v354_v10  ;;  %v373_v39 = vmul.f32 %v365_v32, %v1910_v7  ;;  %v372_v40 = vmul.f32 %v364_v34, %v1914_v8  ;;  %v411_v47 = vld [vmem:[#allocation8 + $0x100] sm:$0xff]  ;;  %v412_v51 = vld [vmem:[#allocation8 + $0x108] sm:$0xff]  ;;  %v382_v54 = vld [vmem:[#allocation8 + $0x18] sm:$0xff]  ;;  %p1562_p0 = por %p1561_p9, %p1560_p10 }
  0x95   : > { %449 = vmatpush1.msra.mxu0 %v353_v11  ;;  %1354 = vmatpush1.msra.mxu1 %v353_v11  ;;  %v371_v41 = vmul.f32 %v363_v36, %v1918_v9  ;;  %v901_v52 = vld [vmem:[%s2318_s4 + $0x20] sm:$0xff]  ;;  %v902_v53 = vld [vmem:[%s2318_s4 + $0x28] sm:$0xff]  ;;  %v413_v55 = vld [vmem:[#allocation8 + $0x110] sm:$0xff] }
  0x96   : > { %450 = vmatprep.subr.mxu0 %v352_v12  ;;  %1339 = vmatprep.subr.mxu1 %v352_v12  ;;  %v903_v56 = vld [vmem:[%s2318_s4 + $0x30] sm:$0xff]  ;;  %v904_v57 = vld [vmem:[%s2318_s4 + $0x38] sm:$0xff]  ;;  %v383_v58 = vld [vmem:[#allocation8 + $0x20] sm:$0xff]  ;;  %p1563_p3 = pnand %p1562_p0, %p1556_p5 }
  0x97   : > { %451 = vmatpush1.msra.mxu0 %v351_v13  ;;  %1355 = vmatpush1.msra.mxu1 %v351_v13  ;;  %v414_v59 = vld [vmem:[#allocation8 + $0x118] sm:$0xff]  ;;  %v905_v60 = vld [vmem:[%s2318_s4 + $0x40] sm:$0xff]  ;;  %v906_v61 = vld [vmem:[%s2318_s4 + $0x48] sm:$0xff] }
  0x98   : > { %452 = vmatprep.subr.mxu0 %v350_v14  ;;  %1340 = vmatprep.subr.mxu1 %v350_v14  ;;  %v384_v62 = vld [vmem:[#allocation8 + $0x28] sm:$0xff]  ;;  %v415_v63 = vld [vmem:[#allocation8 + $0x120] sm:$0xff]  ;;  %v907_v1 = vld [vmem:[%s2318_s4 + $0x50] sm:$0xff] }
  0x99   : > { %453 = vmatpush1.msra.mxu0 %v349_v15  ;;  %1356 = vmatpush1.msra.mxu1 %v349_v15  ;;  %v908_v2 = vld [vmem:[%s2318_s4 + $0x58] sm:$0xff]  ;;  %v385_v3 = vld [vmem:[#allocation8 + $0x30] sm:$0xff]  ;;  %v416_v4 = vld [vmem:[#allocation8 + $0x128] sm:$0xff] }
  0x9a   : > { %454 = vmatprep.subr.mxu0 %v348_v16  ;;  %1341 = vmatprep.subr.mxu1 %v348_v16  ;;  %v909_v5 = vld [vmem:[%s2318_s4 + $0x60] sm:$0xff]  ;;  %v386_v6 = vld [vmem:[#allocation8 + $0x38] sm:$0xff]  ;;  %v417_v7 = vld [vmem:[#allocation8 + $0x130] sm:$0xff] }
  0x9b   : > { %455 = vmatpush1.msra.mxu0 %v347_v17  ;;  %1357 = vmatpush1.msra.mxu1 %v347_v17  ;;  %v387_v8 = vld [vmem:[#allocation8 + $0x40] sm:$0xff]  ;;  %v418_v9 = vld [vmem:[#allocation8 + $0x138] sm:$0xff]  ;;  %v388_v10 = vld [vmem:[#allocation8 + $0x48] sm:$0xff] }
  0x9c   : > { %456 = vmatprep.subr.mxu0 %v346_v18  ;;  %1342 = vmatprep.subr.mxu1 %v346_v18  ;;  %v419_v11 = vld [vmem:[#allocation8 + $0x140] sm:$0xff]  ;;  %v389_v12 = vld [vmem:[#allocation8 + $0x50] sm:$0xff]  ;;  %v420_v13 = vld [vmem:[#allocation8 + $0x148] sm:$0xff] }
  0x9d   : > { %457 = vmatpush1.msra.mxu0 %v345_v19  ;;  %1358 = vmatpush1.msra.mxu1 %v345_v19  ;;  %v390_v14 = vld [vmem:[#allocation8 + $0x58] sm:$0xff]  ;;  %v421_v15 = vld [vmem:[#allocation8 + $0x150] sm:$0xff]  ;;  %v391_v16 = vld [vmem:[#allocation8 + $0x60] sm:$0xff] }
  0x9e   : > { %458 = vmatprep.subr.mxu0 %v344_v20  ;;  %1343 = vmatprep.subr.mxu1 %v344_v20  ;;  %v422_v17 = vld [vmem:[#allocation8 + $0x158] sm:$0xff]  ;;  %v392_v18 = vld [vmem:[#allocation8 + $0x68] sm:$0xff]  ;;  %v423_v19 = vld [vmem:[#allocation8 + $0x160] sm:$0xff] }
  0x9f   : > { %459 = vmatpush1.msra.mxu0 %v343_v22  ;;  %1359 = vmatpush1.msra.mxu1 %v343_v22  ;;  %v393_v20 = vld [vmem:[#allocation8 + $0x70] sm:$0xff]  ;;  %v424_v21 = vld [vmem:[#allocation8 + $0x168] sm:$0xff]  ;;  %v394_v22 = vld [vmem:[#allocation8 + $0x78] sm:$0xff] }
  0xa0   : > { %460 = vmatprep.subr.mxu0 %v342_v24  ;;  %1344 = vmatprep.subr.mxu1 %v342_v24  ;;  %v425_v23 = vld [vmem:[#allocation8 + $0x170] sm:$0xff]  ;;  %v395_v24 = vld [vmem:[#allocation8 + $0x80] sm:$0xff]  ;;  %v426_v25 = vld [vmem:[#allocation8 + $0x178] sm:$0xff] }
  0xa1   : > { %461 = vmatpush1.msra.mxu0 %v341_v26  ;;  %1360 = vmatpush1.msra.mxu1 %v341_v26  ;;  %v396_v26 = vld [vmem:[#allocation8 + $0x88] sm:$0xff]  ;;  %v427_v27 = vld [vmem:[#allocation8 + $0x180] sm:$0xff]  ;;  %v401_v36 = vld [vmem:[#allocation8 + $0xb0] sm:$0xff] }
  0xa2   : > { %462 = vmatprep.subr.mxu0 %v340_v28  ;;  %1345 = vmatprep.subr.mxu1 %v340_v28  ;;  %v397_v28 = vld [vmem:[#allocation8 + $0x90] sm:$0xff]  ;;  %v428_v29 = vld [vmem:[#allocation8 + $0x188] sm:$0xff]  ;;  %v399_v32 = vld [vmem:[#allocation8 + $0xa0] sm:$0xff] }
  0xa3   : > { %463 = vmatpush1.msra.mxu0 %v339_v30  ;;  %1361 = vmatpush1.msra.mxu1 %v339_v30  ;;  %v398_v30 = vld [vmem:[#allocation8 + $0x98] sm:$0xff]  ;;  %v400_v34 = vld [vmem:[#allocation8 + $0xa8] sm:$0xff] }
  0xa4   : > { %464 = vmatprep.subr.mxu0 %v378_v31  ;;  %1346 = vmatprep.subr.mxu1 %v378_v31  ;;  %v429_v31 = vld [vmem:[#allocation8 + $0x190] sm:$0xff] }
  0xa5   : > { %465 = vmatpush1.msra.mxu0 %v377_v33  ;;  %1362 = vmatpush1.msra.mxu1 %v377_v33  ;;  %v430_v33 = vld [vmem:[#allocation8 + $0x198] sm:$0xff] }
  0xa6   : > { %466 = vmatprep.subr.mxu0 %v376_v35  ;;  %1347 = vmatprep.subr.mxu1 %v376_v35  ;;  %v431_v35 = vld [vmem:[#allocation8 + $0x1a0] sm:$0xff] }
  0xa7   : > { %467 = vmatpush1.msra.mxu0 %v375_v37  ;;  %1363 = vmatpush1.msra.mxu1 %v375_v37  ;;  %v432_v37 = vld [vmem:[#allocation8 + $0x1a8] sm:$0xff] }
  0xa8   : > { %468 = vmatprep.subr.mxu0 %v374_v38  ;;  %1348 = vmatprep.subr.mxu1 %v374_v38  ;;  %v402_v38 = vld [vmem:[#allocation8 + $0xb8] sm:$0xff] }
  0xa9   : > { %469 = vmatpush1.msra.mxu0 %v373_v39  ;;  %1364 = vmatpush1.msra.mxu1 %v373_v39  ;;  %v433_v39 = vld [vmem:[#allocation8 + $0x1b0] sm:$0xff] }
  0xaa   : > { %470 = vmatprep.subr.mxu0 %v372_v40  ;;  %1349 = vmatprep.subr.mxu1 %v372_v40  ;;  %v403_v40 = vld [vmem:[#allocation8 + $0xc0] sm:$0xff] }
  0xab   : > { %471 = vmatpush1.msra.mxu0 %v371_v41  ;;  %1365 = vmatpush1.msra.mxu1 %v371_v41  ;;  %v434_v41 = vld [vmem:[#allocation8 + $0x1b8] sm:$0xff] }
  0xac   : > { %505 = vmatmul.mubr.f32.vlgmr.msra.gmra.mxu0 %v379_v42  ;;  %691 = vmatmul.mubr.f32.vlgmr.msra.gmra.mxu1 %v410_v43  ;;  %v404_v42 = vld [vmem:[#allocation8 + $0xc8] sm:$0xff]  ;;  %v435_v43 = vld [vmem:[#allocation8 + $0x1c0] sm:$0xff] }
  0xad   : > { %510 = vmatprep.mubr.f32.mxu0 %v1636_v0  ;;  %696 = vmatprep.mubr.f32.mxu1 %v1636_v0 }
  0xae   : > { %912 = vperm.xlu0 %1441, %v897_v44   ;;  %922 = vperm.xlu1 %1442, %v899_v45   ;;  %v405_v44 = vld [vmem:[#allocation8 + $0xd0] sm:$0xff]  ;;  %v436_v45 = vld [vmem:[#allocation8 + $0x1c8] sm:$0xff] }
  0xb0   : > { %511 = vmatmul.mubr.f32.gmra.mxu0 %v380_v46  ;;  %697 = vmatmul.mubr.f32.gmra.mxu1 %v411_v47  ;;  %v406_v46 = vld [vmem:[#allocation8 + $0xd8] sm:$0xff]  ;;  %v437_v47 = vld [vmem:[#allocation8 + $0x1d0] sm:$0xff] }
  0xb1   : > { %516 = vmatprep.mubr.f32.mxu0 %v1636_v0  ;;  %702 = vmatprep.mubr.f32.mxu1 %v1636_v0 }
  0xb2   : > { %917 = vperm.xlu0 %1441, %v898_v48   ;;  %927 = vperm.xlu1 %1442, %v900_v49   ;;  %v407_v48 = vld [vmem:[#allocation8 + $0xe0] sm:$0xff]  ;;  %v438_v49 = vld [vmem:[#allocation8 + $0x1d8] sm:$0xff] }
  0xb4   : > { %517 = vmatmul.mubr.f32.gmra.mxu0 %v381_v50  ;;  %703 = vmatmul.mubr.f32.gmra.mxu1 %v412_v51  ;;  %v408_v50 = vld [vmem:[#allocation8 + $0xe8] sm:$0xff]  ;;  %v439_v51 = vld [vmem:[#allocation8 + $0x1e0] sm:$0xff] }
  0xb5   : > { %522 = vmatprep.mubr.f32.mxu0 %v1636_v0  ;;  %708 = vmatprep.mubr.f32.mxu1 %v1636_v0 }
  0xb6   : > { %932 = vperm.xlu0 %1441, %v901_v52   ;;  %937 = vperm.xlu1 %1442, %v902_v53   ;;  %v409_v52 = vld [vmem:[#allocation8 + $0xf0] sm:$0xff] }
  0xb8   : > { %523 = vmatmul.mubr.f32.gmra.mxu0 %v382_v54  ;;  %709 = vmatmul.mubr.f32.gmra.mxu1 %v413_v55 }
  0xb9   : > { %528 = vmatprep.mubr.f32.mxu0 %v1636_v0  ;;  %714 = vmatprep.mubr.f32.mxu1 %v1636_v0 }
  0xba   : > { %942 = vperm.xlu0 %1441, %v903_v56   ;;  %947 = vperm.xlu1 %1442, %v904_v57  }
  0xbc   : > { %529 = vmatmul.mubr.f32.gmra.mxu0 %v383_v58  ;;  %715 = vmatmul.mubr.f32.gmra.mxu1 %v414_v59 }
  0xbd   : > { %534 = vmatprep.mubr.f32.mxu0 %v1636_v0  ;;  %720 = vmatprep.mubr.f32.mxu1 %v1636_v0 }
  0xbe   : > { %952 = vperm.xlu0 %1441, %v905_v60   ;;  %957 = vperm.xlu1 %1442, %v906_v61  }
  0xc0   : > { %535 = vmatmul.mubr.f32.gmra.mxu0 %v384_v62  ;;  %721 = vmatmul.mubr.f32.gmra.mxu1 %v415_v63 }
  0xc1   : > { %540 = vmatprep.mubr.f32.mxu0 %v1636_v0  ;;  %726 = vmatprep.mubr.f32.mxu1 %v1636_v0 }
  0xc2   : > { %962 = vperm.xlu0 %1441, %v907_v1   ;;  %967 = vperm.xlu1 %1442, %v908_v2  }
  0xc4   : > { %541 = vmatmul.mubr.f32.gmra.mxu0 %v385_v3  ;;  %727 = vmatmul.mubr.f32.gmra.mxu1 %v416_v4 }
  0xc5   : > { %546 = vmatprep.mubr.f32.mxu0 %v1636_v0  ;;  %732 = vmatprep.mubr.f32.mxu1 %v1636_v0 }
  0xc6   : > { %972 = vperm.xlu0 %1441, %v909_v5  }
  0xc8   : > { %547 = vmatmul.mubr.f32.gmra.mxu0 %v386_v6  ;;  %733 = vmatmul.mubr.f32.gmra.mxu1 %v417_v7 }
  0xc9   : > { %552 = vmatprep.mubr.f32.mxu0 %v1636_v0  ;;  %738 = vmatprep.mubr.f32.mxu1 %v1636_v0 }
  0xcc   : > { %553 = vmatmul.mubr.f32.gmra.mxu0 %v387_v8  ;;  %739 = vmatmul.mubr.f32.gmra.mxu1 %v418_v9 }
  0xcd   : > { %558 = vmatprep.mubr.f32.mxu0 %v1636_v0  ;;  %744 = vmatprep.mubr.f32.mxu1 %v1636_v0 }
  0xd0   : > { %559 = vmatmul.mubr.f32.gmra.mxu0 %v388_v10  ;;  %745 = vmatmul.mubr.f32.gmra.mxu1 %v419_v11 }
  0xd1   : > { %564 = vmatprep.mubr.f32.mxu0 %v1636_v0  ;;  %750 = vmatprep.mubr.f32.mxu1 %v1636_v0 }
  0xd4   : > { %565 = vmatmul.mubr.f32.gmra.mxu0 %v389_v12  ;;  %751 = vmatmul.mubr.f32.gmra.mxu1 %v420_v13 }
  0xd5   : > { %570 = vmatprep.mubr.f32.mxu0 %v1636_v0  ;;  %756 = vmatprep.mubr.f32.mxu1 %v1636_v0 }
  0xd8   : > { %571 = vmatmul.mubr.f32.gmra.mxu0 %v390_v14  ;;  %757 = vmatmul.mubr.f32.gmra.mxu1 %v421_v15 }
  0xd9   : > { %576 = vmatprep.mubr.f32.mxu0 %v1636_v0  ;;  %762 = vmatprep.mubr.f32.mxu1 %v1636_v0 }
  0xdc   : > { %577 = vmatmul.mubr.f32.gmra.mxu0 %v391_v16  ;;  %763 = vmatmul.mubr.f32.gmra.mxu1 %v422_v17 }
  0xdd   : > { %582 = vmatprep.mubr.f32.mxu0 %v1636_v0  ;;  %768 = vmatprep.mubr.f32.mxu1 %v1636_v0 }
  0xe0   : > { %583 = vmatmul.mubr.f32.gmra.mxu0 %v392_v18  ;;  %769 = vmatmul.mubr.f32.gmra.mxu1 %v423_v19 }
  0xe1   : > { %588 = vmatprep.mubr.f32.mxu0 %v1636_v0  ;;  %774 = vmatprep.mubr.f32.mxu1 %v1636_v0 }
  0xe4   : > { %589 = vmatmul.mubr.f32.gmra.mxu0 %v393_v20  ;;  %775 = vmatmul.mubr.f32.gmra.mxu1 %v424_v21 }
  0xe5   : > { %594 = vmatprep.mubr.f32.mxu0 %v1636_v0  ;;  %780 = vmatprep.mubr.f32.mxu1 %v1636_v0 }
  0xe8   : > { %595 = vmatmul.mubr.f32.gmra.mxu0 %v394_v22  ;;  %781 = vmatmul.mubr.f32.gmra.mxu1 %v425_v23 }
  0xe9   : > { %600 = vmatprep.mubr.f32.mxu0 %v1636_v0  ;;  %786 = vmatprep.mubr.f32.mxu1 %v1636_v0 }
  0xec   : > { %601 = vmatmul.mubr.f32.gmra.mxu0 %v395_v24  ;;  %787 = vmatmul.mubr.f32.gmra.mxu1 %v426_v25 }
  0xed   : > { %606 = vmatprep.mubr.f32.mxu0 %v1636_v0  ;;  %792 = vmatprep.mubr.f32.mxu1 %v1636_v0 }
  0xf0   : > { %607 = vmatmul.mubr.f32.gmra.mxu0 %v396_v26  ;;  %793 = vmatmul.mubr.f32.gmra.mxu1 %v427_v27 }
  0xf1   : > { %612 = vmatprep.mubr.f32.mxu0 %v1636_v0  ;;  %798 = vmatprep.mubr.f32.mxu1 %v1636_v0 }
  0xf4   : > { %613 = vmatmul.mubr.f32.gmra.mxu0 %v397_v28  ;;  %799 = vmatmul.mubr.f32.gmra.mxu1 %v428_v29 }
  0xf5   : > { %618 = vmatprep.mubr.f32.mxu0 %v1636_v0  ;;  %804 = vmatprep.mubr.f32.mxu1 %v1636_v0 }
  0xf8   : > { %619 = vmatmul.mubr.f32.gmra.mxu0 %v398_v30  ;;  %805 = vmatmul.mubr.f32.gmra.mxu1 %v429_v31 }
  0xf9   : > { %624 = vmatprep.mubr.f32.mxu0 %v1636_v0  ;;  %810 = vmatprep.mubr.f32.mxu1 %v1636_v0 }
  0xfc   : > { %625 = vmatmul.mubr.f32.gmra.mxu0 %v399_v32  ;;  %811 = vmatmul.mubr.f32.gmra.mxu1 %v430_v33 }
  0xfd   : > { %630 = vmatprep.mubr.f32.mxu0 %v1636_v0  ;;  %816 = vmatprep.mubr.f32.mxu1 %v1636_v0 }
 0x100   : > { %631 = vmatmul.mubr.f32.gmra.mxu0 %v400_v34  ;;  %817 = vmatmul.mubr.f32.gmra.mxu1 %v431_v35 }
 0x101   : > { %636 = vmatprep.mubr.f32.mxu0 %v1636_v0  ;;  %822 = vmatprep.mubr.f32.mxu1 %v1636_v0 }
 0x104   : > { %637 = vmatmul.mubr.f32.gmra.mxu0 %v401_v36  ;;  %823 = vmatmul.mubr.f32.gmra.mxu1 %v432_v37 }
 0x105   : > { %642 = vmatprep.mubr.f32.mxu0 %v1636_v0  ;;  %828 = vmatprep.mubr.f32.mxu1 %v1636_v0 }
 0x108   : > { %643 = vmatmul.mubr.f32.gmra.mxu0 %v402_v38  ;;  %829 = vmatmul.mubr.f32.gmra.mxu1 %v433_v39 }
 0x109   : > { %648 = vmatprep.mubr.f32.mxu0 %v1636_v0  ;;  %834 = vmatprep.mubr.f32.mxu1 %v1636_v0 }
 0x10c   : > { %649 = vmatmul.mubr.f32.gmra.mxu0 %v403_v40  ;;  %835 = vmatmul.mubr.f32.gmra.mxu1 %v434_v41 }
 0x10d   : > { %654 = vmatprep.mubr.f32.mxu0 %v1636_v0  ;;  %840 = vmatprep.mubr.f32.mxu1 %v1636_v0 }
 0x110   : > { %655 = vmatmul.mubr.f32.gmra.mxu0 %v404_v42  ;;  %841 = vmatmul.mubr.f32.gmra.mxu1 %v435_v43 }
 0x111   : > { %660 = vmatprep.mubr.f32.mxu0 %v1636_v0  ;;  %846 = vmatprep.mubr.f32.mxu1 %v1636_v0 }
 0x114   : > { %661 = vmatmul.mubr.f32.gmra.mxu0 %v405_v44  ;;  %847 = vmatmul.mubr.f32.gmra.mxu1 %v436_v45 }
 0x115   : > { %666 = vmatprep.mubr.f32.mxu0 %v1636_v0  ;;  %852 = vmatprep.mubr.f32.mxu1 %v1636_v0 }
 0x118   : > { %667 = vmatmul.mubr.f32.gmra.mxu0 %v406_v46  ;;  %853 = vmatmul.mubr.f32.gmra.mxu1 %v437_v47 }
 0x119   : > { %672 = vmatprep.mubr.f32.mxu0 %v1636_v0  ;;  %858 = vmatprep.mubr.f32.mxu1 %v1636_v0 }
 0x11c   : > { %673 = vmatmul.mubr.f32.gmra.mxu0 %v407_v48  ;;  %859 = vmatmul.mubr.f32.gmra.mxu1 %v438_v49 }
 0x11d   : > { %678 = vmatprep.mubr.f32.mxu0 %v1636_v0  ;;  %864 = vmatprep.mubr.f32.mxu1 %v1636_v0 }
 0x120   : > { %679 = vmatmul.mubr.f32.gmra.mxu0 %v408_v50  ;;  %865 = vmatmul.mubr.f32.gmra.mxu1 %v439_v51 }
 0x121   : > { %684 = vmatprep.mubr.f32.mxu0 %v1636_v0 }
 0x124   : > { %685 = vmatmul.mubr.f32.gmra.mxu0 %v409_v52 }
 0x129   : > { %v913_v53 = vpop.permute.xlu0 %912  ;;  %v923_v1 = vpop.permute.xlu1 %922 }
 0x12d   : > { %v918_v59 = vpop.permute.xlu0 %917  ;;  %v928_v17 = vpop.permute.xlu1 %927 }
 0x131   : > { %v933_v28 = vpop.permute.xlu0 %932  ;;  %v938_v39 = vpop.permute.xlu1 %937 }
 0x135   : > { %v943_v50 = vpop.permute.xlu0 %942 }
 0x16c   : > { %v506_v54 = vpop.f32.mrf.mxu0  ;;  %v2048_v55 = vpop.f32.mrf.mxu1 }
 0x16d   : > { %v871_v58 = vmax.f32 %v506_v54, 0.0 }
 0x16e   : > { %v508_v56 = vpop.f32.mrf.mxu0  ;;  %v2050_v57 = vpop.f32.mrf.mxu1 }
 0x16f   : > { %v872_v62 = vmax.f32 %v508_v56, 0.0  ;;  %v975_v0 = vmul.f32 %v913_v53, %v871_v58 }
 0x170   : > { %v512_v60 = vpop.f32.mrf.mxu0  ;;  %v2052_v61 = vpop.f32.mrf.mxu1 }
 0x171   : > { %v873_v63 = vmax.f32 %v512_v60, 0.0  ;;  %v976_v8 = vmul.f32 %v913_v53, %v872_v62 }
 0x172   : > { %v514_v2 = vpop.f32.mrf.mxu0  ;;  %v2054_v3 = vpop.f32.mrf.mxu1 }
 0x173   : > { %v977_v4 = vmul.f32 %v918_v59, %v873_v63  ;;  %v874_v5 = vmax.f32 %v514_v2, 0.0 }
 0x174   : > { %v518_v6 = vpop.f32.mrf.mxu0  ;;  %v2056_v7 = vpop.f32.mrf.mxu1 }
 0x175   : > { %v1001_v9 = vadd.f32 %v977_v4, %v975_v0  ;;  %v978_v10 = vmul.f32 %v918_v59, %v874_v5  ;;  %v875_v11 = vmax.f32 %v518_v6, 0.0 }
 0x176   : > { %v520_v12 = vpop.f32.mrf.mxu0  ;;  %v2058_v13 = vpop.f32.mrf.mxu1 }
 0x177   : > { %v1019_v14 = vadd.f32 %v978_v10, %v976_v8  ;;  %v979_v15 = vmul.f32 %v923_v1, %v875_v11  ;;  %v876_v16 = vmax.f32 %v520_v12, 0.0 }
 0x178   : > { %v524_v18 = vpop.f32.mrf.mxu0  ;;  %v2060_v19 = vpop.f32.mrf.mxu1 }
 0x179   : > { %v1002_v20 = vadd.f32 %v1001_v9, %v979_v15  ;;  %v980_v21 = vmul.f32 %v923_v1, %v876_v16  ;;  %v877_v22 = vmax.f32 %v524_v18, 0.0  ;;  %v948_v1 = vpop.permute.xlu1 %947 }
 0x17a   : > { %v526_v23 = vpop.f32.mrf.mxu0  ;;  %v2062_v24 = vpop.f32.mrf.mxu1 }
 0x17b   : > { %v1020_v25 = vadd.f32 %v1019_v14, %v980_v21  ;;  %v981_v26 = vmul.f32 %v928_v17, %v877_v22  ;;  %v878_v27 = vmax.f32 %v526_v23, 0.0  ;;  %v953_v14 = vpop.permute.xlu0 %952 }
 0x17c   : > { %v530_v29 = vpop.f32.mrf.mxu0  ;;  %v2064_v30 = vpop.f32.mrf.mxu1 }
 0x17d   : > { %v1003_v31 = vadd.f32 %v1002_v20, %v981_v26  ;;  %v982_v32 = vmul.f32 %v928_v17, %v878_v27  ;;  %v879_v33 = vmax.f32 %v530_v29, 0.0  ;;  %v958_v27 = vpop.permute.xlu1 %957 }
 0x17e   : > { %v532_v34 = vpop.f32.mrf.mxu0  ;;  %v2066_v35 = vpop.f32.mrf.mxu1 }
 0x17f   : > { %v1021_v36 = vadd.f32 %v1020_v25, %v982_v32  ;;  %v983_v37 = vmul.f32 %v933_v28, %v879_v33  ;;  %v880_v38 = vmax.f32 %v532_v34, 0.0 }
 0x180   : > { %v536_v40 = vpop.f32.mrf.mxu0  ;;  %v2068_v41 = vpop.f32.mrf.mxu1 }
 0x181   : > { %v1004_v42 = vadd.f32 %v1003_v31, %v983_v37  ;;  %v984_v43 = vmul.f32 %v933_v28, %v880_v38  ;;  %v881_v44 = vmax.f32 %v536_v40, 0.0  ;;  %v963_v40 = vpop.permute.xlu0 %962 }
 0x182   : > { %v538_v45 = vpop.f32.mrf.mxu0  ;;  %v2070_v46 = vpop.f32.mrf.mxu1 }
 0x183   : > { %v1022_v47 = vadd.f32 %v1021_v36, %v984_v43  ;;  %v985_v48 = vmul.f32 %v938_v39, %v881_v44  ;;  %v882_v49 = vmax.f32 %v538_v45, 0.0 }
 0x184   : > { %v542_v51 = vpop.f32.mrf.mxu0  ;;  %v2072_v52 = vpop.f32.mrf.mxu1 }
 0x185   : > { %v1005_v53 = vadd.f32 %v1004_v42, %v985_v48  ;;  %v986_v54 = vmul.f32 %v938_v39, %v882_v49  ;;  %v883_v56 = vmax.f32 %v542_v51, 0.0 }
 0x186   : > { %v544_v58 = vpop.f32.mrf.mxu0  ;;  %v2074_v59 = vpop.f32.mrf.mxu1 }
 0x187   : > { %v1023_v60 = vadd.f32 %v1022_v47, %v986_v54  ;;  %v987_v62 = vmul.f32 %v943_v50, %v883_v56  ;;  %v884_v63 = vmax.f32 %v544_v58, 0.0  ;;  %v968_v54 = vpop.permute.xlu1 %967 }
 0x188   : > { %v548_v2 = vpop.f32.mrf.mxu0  ;;  %v2076_v0 = vpop.f32.mrf.mxu1 }
 0x189   : > { %2364 = vst [vmem:[#allocation20_spill] sm:$0xff] %v2076_v0  ;;  %v1006_v4 = vadd.f32 %v1005_v53, %v987_v62  ;;  %v988_v5 = vmul.f32 %v943_v50, %v884_v63  ;;  %v885_v6 = vmax.f32 %v548_v2, 0.0 }
 0x18a   : > { %v550_v8 = vpop.f32.mrf.mxu0  ;;  %v2078_v9 = vpop.f32.mrf.mxu1 }
 0x18b   : > { %2365 = vst [vmem:[#allocation21_spill] sm:$0xff] %v2078_v9  ;;  %v1024_v10 = vadd.f32 %v1023_v60, %v988_v5  ;;  %v989_v11 = vmul.f32 %v948_v1, %v885_v6  ;;  %v886_v12 = vmax.f32 %v550_v8, 0.0  ;;  %v973_v8 = vpop.permute.xlu0 %972 }
 0x18c   : > { %v554_v15 = vpop.f32.mrf.mxu0  ;;  %v2080_v16 = vpop.f32.mrf.mxu1 }
 0x18d   : > { %2366 = vst [vmem:[#allocation22_spill] sm:$0xff] %v2080_v16  ;;  %v1007_v17 = vadd.f32 %v1006_v4, %v989_v11  ;;  %v990_v18 = vmul.f32 %v948_v1, %v886_v12  ;;  %v887_v20 = vmax.f32 %v554_v15, 0.0 }
 0x18e   : > { %v556_v21 = vpop.f32.mrf.mxu0  ;;  %v2082_v22 = vpop.f32.mrf.mxu1 }
 0x18f   : > { %2367 = vst [vmem:[#allocation23_spill] sm:$0xff] %v2082_v22  ;;  %v1025_v23 = vadd.f32 %v1024_v10, %v990_v18  ;;  %v991_v25 = vmul.f32 %v953_v14, %v887_v20  ;;  %v888_v26 = vmax.f32 %v556_v21, 0.0 }
 0x190   : > { %v560_v28 = vpop.f32.mrf.mxu0  ;;  %v2084_v29 = vpop.f32.mrf.mxu1 }
 0x191   : > { %2368 = vst [vmem:[#allocation24_spill] sm:$0xff] %v2084_v29  ;;  %v1008_v31 = vadd.f32 %v1007_v17, %v991_v25  ;;  %v992_v32 = vmul.f32 %v953_v14, %v888_v26  ;;  %v889_v33 = vmax.f32 %v560_v28, 0.0 }
 0x192   : > { %v562_v34 = vpop.f32.mrf.mxu0  ;;  %v2086_v36 = vpop.f32.mrf.mxu1 }
 0x193   : > { %2369 = vst [vmem:[#allocation25_spill] sm:$0xff] %v2086_v36  ;;  %v1026_v37 = vadd.f32 %v1025_v23, %v992_v32  ;;  %v993_v38 = vmul.f32 %v958_v27, %v889_v33  ;;  %v890_v39 = vmax.f32 %v562_v34, 0.0 }
 0x194   : > { %v566_v42 = vpop.f32.mrf.mxu0  ;;  %v2088_v43 = vpop.f32.mrf.mxu1 }
 0x195   : > { %2370 = vst [vmem:[#allocation26_spill] sm:$0xff] %v2088_v43  ;;  %v1009_v44 = vadd.f32 %v1008_v31, %v993_v38  ;;  %v994_v45 = vmul.f32 %v958_v27, %v890_v39  ;;  %v891_v47 = vmax.f32 %v566_v42, 0.0 }
 0x196   : > { %v568_v48 = vpop.f32.mrf.mxu0  ;;  %v2090_v49 = vpop.f32.mrf.mxu1 }
 0x197   : > { %2371 = vst [vmem:[#allocation27_spill] sm:$0xff] %v2090_v49  ;;  %v1027_v50 = vadd.f32 %v1026_v37, %v994_v45  ;;  %v995_v51 = vmul.f32 %v963_v40, %v891_v47  ;;  %v892_v53 = vmax.f32 %v568_v48, 0.0 }
 0x198   : > { %v572_v56 = vpop.f32.mrf.mxu0  ;;  %v2092_v58 = vpop.f32.mrf.mxu1 }
 0x199   : > { %2372 = vst [vmem:[#allocation28_spill] sm:$0xff] %v2092_v58  ;;  %v1010_v60 = vadd.f32 %v1009_v44, %v995_v51  ;;  %v996_v62 = vmul.f32 %v963_v40, %v892_v53  ;;  %v893_v63 = vmax.f32 %v572_v56, 0.0 }
 0x19a   : > { %v574_v1 = vpop.f32.mrf.mxu0  ;;  %v2094_v2 = vpop.f32.mrf.mxu1 }
 0x19b   : > { %2373 = vst [vmem:[#allocation29_spill] sm:$0xff] %v2094_v2  ;;  %v1028_v4 = vadd.f32 %v1027_v50, %v996_v62  ;;  %v997_v5 = vmul.f32 %v968_v54, %v893_v63  ;;  %v894_v6 = vmax.f32 %v574_v1, 0.0 }
 0x19c   : > { %v578_v10 = vpop.f32.mrf.mxu0  ;;  %v2096_v11 = vpop.f32.mrf.mxu1 }
 0x19d   : > { %2374 = vst [vmem:[#allocation30_spill] sm:$0xff] %v2096_v11  ;;  %v1011_v12 = vadd.f32 %v1010_v60, %v997_v5  ;;  %v998_v14 = vmul.f32 %v968_v54, %v894_v6  ;;  %v895_v15 = vmax.f32 %v578_v10, 0.0 }
 0x19e   : > { %v580_v17 = vpop.f32.mrf.mxu0  ;;  %v2098_v18 = vpop.f32.mrf.mxu1 }
 0x19f   : > { %2375 = vst [vmem:[#allocation31_spill] sm:$0xff] %v2098_v18  ;;  %v1029_v20 = vadd.f32 %v1028_v4, %v998_v14  ;;  %v999_v21 = vmul.f32 %v973_v8, %v895_v15  ;;  %v896_v23 = vmax.f32 %v580_v17, 0.0 }
 0x1a0   : > { %v2100_v25 = vpop.f32.mrf.mxu0  ;;  %v2102_v26 = vpop.f32.mrf.mxu1 }
 0x1a1   : > { %2376 = vst [vmem:[#allocation32_spill] sm:$0xff] %v2102_v26  ;;  %v2104_v27 = vadd.f32 %v1011_v12, %v999_v21  ;;  %v1000_v28 = vmul.f32 %v973_v8, %v896_v23 }
 0x1a2   : > { %v586_v31 = vpop.f32.mrf.mxu0  ;;  %v2106_v32 = vpop.f32.mrf.mxu1 }
 0x1a3   : > { %2377 = vst [vmem:[#allocation33_spill] sm:$0xff] %v2104_v27  ;;  %2378 = vst [vmem:[#allocation34_spill] sm:$0xff] %v2106_v32  ;;  %v2108_v33 = vadd.f32 %v1029_v20, %v1000_v28 }
 0x1a4   : > { %v590_v34 = vpop.f32.mrf.mxu0  ;;  %v776_v37 = vpop.f32.mrf.mxu1 }
 0x1a5   : > { %2379 = vst [vmem:[#allocation35_spill] sm:$0xff] %v2108_v33 }
 0x1a6   : > { %v2110_v38 = vpop.f32.mrf.mxu0  ;;  %v2112_v39 = vpop.f32.mrf.mxu1 }
 0x1a8   : > { %v596_v40 = vpop.f32.mrf.mxu0  ;;  %v782_v42 = vpop.f32.mrf.mxu1 }
 0x1a9   : > { %v1041_v44 = vmul.f32 %v2048_v55, %v596_v40 }
 0x1aa   : > { %v598_v45 = vpop.f32.mrf.mxu0  ;;  %v2115_v47 = vpop.f32.mrf.mxu1 }
 0x1ac   : > { %v602_v48 = vpop.f32.mrf.mxu0  ;;  %v788_v50 = vpop.f32.mrf.mxu1 }
 0x1ae   : > { %v604_v51 = vpop.f32.mrf.mxu0  ;;  %v790_v53 = vpop.f32.mrf.mxu1 }
 0x1b0   : > { %v608_v54 = vpop.f32.mrf.mxu0  ;;  %v794_v56 = vpop.f32.mrf.mxu1 }
 0x1b2   : > { %v2117_v60 = vpop.f32.mrf.mxu0  ;;  %v2119_v62 = vpop.f32.mrf.mxu1 }
 0x1b4   : > { %v2121_v63 = vpop.f32.mrf.mxu0  ;;  %v2123_v1 = vpop.f32.mrf.mxu1 }
 0x1b6   : > { %v2125_v4 = vpop.f32.mrf.mxu0  ;;  %v2127_v55 = vpop.f32.mrf.mxu1 }
 0x1b8   : > { %v2129_v5 = vpop.f32.mrf.mxu0  ;;  %v2131_v6 = vpop.f32.mrf.mxu1 }
 0x1ba   : > { %v2133_v8 = vpop.f32.mrf.mxu0  ;;  %v2135_v10 = vpop.f32.mrf.mxu1 }
 0x1bc   : > { %v2137_v12 = vpop.f32.mrf.mxu0  ;;  %v2139_v14 = vpop.f32.mrf.mxu1 }
 0x1be   : > { %v2141_v15 = vpop.f32.mrf.mxu0  ;;  %v2143_v17 = vpop.f32.mrf.mxu1 }
 0x1c0   : > { %v2145_v20 = vpop.f32.mrf.mxu0  ;;  %v2147_v21 = vpop.f32.mrf.mxu1 }
 0x1c2   : > { %v2149_v23 = vpop.f32.mrf.mxu0  ;;  %v2151_v28 = vpop.f32.mrf.mxu1 }
 0x1c4   : > { %v2153_v40 = vpop.f32.mrf.mxu0  ;;  %v2155_v32 = vpop.f32.mrf.mxu1 }
 0x1c5   : > { %2380 = vst [vmem:[#allocation36_spill] sm:$0xff] %v2155_v32  ;;  %v1073_v32 = vmul.f32 %v1041_v44, %v788_v50  ;;  %v1053_v44 = vmul.f32 %v2072_v52, %v2145_v20  ;;  %v2401_v50 = vld [vmem:[#allocation20_spill] sm:$0xff] }
 0x1c6   : > { %v2157_v26 = vpop.f32.mrf.mxu0  ;;  %v2161_v11 = vpop.f32.mrf.mxu1 }
 0x1c7   : > { %2381 = vst [vmem:[#allocation37_spill] sm:$0xff] %v2157_v26  ;;  %2383 = vst [vmem:[#allocation39_spill] sm:$0xff] %v2161_v11 }
 0x1c8   : > { %v2159_v18 = vpop.f32.mrf.mxu0  ;;  %v2167_v58 = vpop.f32.mrf.mxu1 }
 0x1c9   : > { %2382 = vst [vmem:[#allocation38_spill] sm:$0xff] %v2159_v18  ;;  %2386 = vst [vmem:[#allocation42_spill] sm:$0xff] %v2167_v58 }
 0x1ca   : > { %v2163_v2 = vpop.f32.mrf.mxu0  ;;  %v2173_v43 = vpop.f32.mrf.mxu1 }
 0x1cb   : > { %2384 = vst [vmem:[#allocation40_spill] sm:$0xff] %v2163_v2  ;;  %2389 = vst [vmem:[#allocation45_spill] sm:$0xff] %v2173_v43 }
 0x1cc   : > { %v2165_v33 = vpop.f32.mrf.mxu0  ;;  %v2179_v22 = vpop.f32.mrf.mxu1 }
 0x1cd   : > { %2385 = vst [vmem:[#allocation41_spill] sm:$0xff] %v2165_v33  ;;  %2392 = vst [vmem:[#allocation48_spill] sm:$0xff] %v2179_v22 }
 0x1ce   : > { %v2169_v49 = vpop.f32.mrf.mxu0  ;;  %v2185_v2 = vpop.f32.mrf.mxu1  ;;  %v2405_v52 = vld [vmem:[#allocation39_spill] sm:$0xff] }
 0x1cf   : > { %2387 = vst [vmem:[#allocation43_spill] sm:$0xff] %v2169_v49  ;;  %2395 = vst [vmem:[#allocation51_spill] sm:$0xff] %v2185_v2 }
 0x1d0   : > { %v2171_v27 = vpop.f32.mrf.mxu0  ;;  %v2191_v49 = vpop.f32.mrf.mxu1 }
 0x1d1   : > { %2388 = vst [vmem:[#allocation44_spill] sm:$0xff] %v2171_v27  ;;  %2398 = vst [vmem:[#allocation54_spill] sm:$0xff] %v2191_v49  ;;  %v1042_v49 = vmul.f32 %v2050_v57, %v598_v45  ;;  %v1046_v57 = vmul.f32 %v2058_v13, %v2117_v60  ;;  %v2403_v60 = vld [vmem:[#allocation37_spill] sm:$0xff] }
 0x1d2   : > { %v2175_v36 = vpop.f32.mrf.mxu0  ;;  %v2411_v20 = vld [vmem:[#allocation45_spill] sm:$0xff] }
 0x1d3   : > { %2390 = vst [vmem:[#allocation46_spill] sm:$0xff] %v2175_v36  ;;  %v2195_v36 = vpop.f32.mrf.mxu1 }
 0x1d4   : > { %v2177_v29 = vpop.f32.mrf.mxu0  ;;  %2400 = vst [vmem:[#allocation56_spill] sm:$0xff] %v2195_v36 }
 0x1d5   : > { %2391 = vst [vmem:[#allocation47_spill] sm:$0xff] %v2177_v29 }
 0x1d6   : > { %v2181_v16 = vpop.f32.mrf.mxu0 }
 0x1d7   : > { %2393 = vst [vmem:[#allocation49_spill] sm:$0xff] %v2181_v16 }
 0x1d8   : > { %v2183_v18 = vpop.f32.mrf.mxu0 }
 0x1d9   : > { %2394 = vst [vmem:[#allocation50_spill] sm:$0xff] %v2183_v18  ;;  %v2198_v18 = vpop.f32.mrf.mxu1 }
 0x1da   : > { %v2187_v33 = vpop.f32.mrf.mxu0 }
 0x1db   : > { %2396 = vst [vmem:[#allocation52_spill] sm:$0xff] %v2187_v33 }
 0x1dc   : > { %v2189_v58 = vpop.f32.mrf.mxu0 }
 0x1dd   : > { %2397 = vst [vmem:[#allocation53_spill] sm:$0xff] %v2189_v58 }
 0x1de   : > { %v2193_v27 = vpop.f32.mrf.mxu0 }
 0x1df   : > { %2399 = vst [vmem:[#allocation55_spill] sm:$0xff] %v2193_v27  ;;  %v1043_v27 = vmul.f32 %v2052_v61, %v602_v48 }
 0x1e0   : > { %v680_v43 = vpop.f32.mrf.mxu0 }
 0x1e1   : > { %v1037_v22 = vmul.f32 %v680_v43, %v2100_v25  ;;  %v2206_v25 = vpop.f32.mrf.mxu1 }
 0x1e2   : > { %v682_v29 = vpop.f32.mrf.mxu0 }
 0x1e3   : > { %v1038_v16 = vmul.f32 %v682_v29, %v586_v31  ;;  %v1069_v26 = vmul.f32 %v1037_v22, %v776_v37  ;;  %v1044_v29 = vmul.f32 %v2054_v3, %v604_v51  ;;  %v1045_v22 = vmul.f32 %v2056_v7, %v608_v54 }
 0x1e4   : > { %v686_v11 = vpop.f32.mrf.mxu0  ;;  %v1078_v7 = vmul.f32 %v1046_v57, %v2127_v55  ;;  %v1055_v51 = vmul.f32 %v2401_v50, %v2153_v40  ;;  %v2406_v55 = vld [vmem:[#allocation38_spill] sm:$0xff]  ;;  %v2417_v57 = vld [vmem:[#allocation51_spill] sm:$0xff]  ;;  %v2429_v50 = vld [vmem:[#allocation29_spill] sm:$0xff] }
 0x1e5   : > { %v1039_v9 = vmul.f32 %v686_v11, %v590_v34  ;;  %v1070_v36 = vmul.f32 %v1038_v16, %v2112_v39  ;;  %v1074_v11 = vmul.f32 %v1042_v49, %v790_v53  ;;  %v1076_v61 = vmul.f32 %v1044_v29, %v2119_v62  ;;  %v2402_v53 = vld [vmem:[#allocation36_spill] sm:$0xff]  ;;  %v2404_v62 = vld [vmem:[#allocation21_spill] sm:$0xff] }
 0x1e6   : > { %v688_v2 = vpop.f32.mrf.mxu0  ;;  %v1047_v16 = vmul.f32 %v2060_v19, %v2121_v63  ;;  %v1048_v49 = vmul.f32 %v2062_v24, %v2125_v4  ;;  %v1050_v19 = vmul.f32 %v2066_v35, %v2133_v8  ;;  %v1051_v34 = vmul.f32 %v2068_v41, %v2137_v12  ;;  %v2408_v8 = vld [vmem:[#allocation42_spill] sm:$0xff] }
 0x1e7   : > { %v1071_v33 = vmul.f32 %v1039_v9, %v782_v42  ;;  %v1040_v58 = vmul.f32 %v688_v2, %v2110_v38  ;;  %v1075_v9 = vmul.f32 %v1043_v27, %v794_v56  ;;  %v854_v27 = vpop.f32.mrf.mxu1  ;;  %v1052_v39 = vmul.f32 %v2070_v46, %v2141_v15  ;;  %v2410_v15 = vld [vmem:[#allocation23_spill] sm:$0xff] }
 0x1e8   : > { %v1079_v13 = vmul.f32 %v1047_v16, %v2131_v6  ;;  %v1083_v35 = vmul.f32 %v1051_v34, %v2147_v21  ;;  %v1054_v41 = vmul.f32 %v2074_v59, %v2149_v23  ;;  %v1085_v46 = vmul.f32 %v1053_v44, %v2402_v53  ;;  %v2412_v23 = vld [vmem:[#allocation41_spill] sm:$0xff] }
 0x1e9   : > { %v1101_v0 = vadd.f32 %v1071_v33, %v1069_v26  ;;  %v1072_v43 = vmul.f32 %v1040_v58, %v2115_v47  ;;  %v1077_v58 = vmul.f32 %v1045_v22, %v2123_v1  ;;  %v1080_v33 = vmul.f32 %v1048_v49, %v2135_v10  ;;  %v856_v42 = vpop.f32.mrf.mxu1  ;;  %v2420_v49 = vld [vmem:[#allocation54_spill] sm:$0xff] }
 0x1ea   : > { %v1084_v48 = vmul.f32 %v1052_v39, %v2151_v28  ;;  %v1056_v63 = vmul.f32 %v2404_v62, %v2403_v60  ;;  %v1086_v1 = vmul.f32 %v1054_v41, %v2405_v52  ;;  %v1087_v59 = vmul.f32 %v1055_v51, %v2408_v8  ;;  %v2413_v28 = vld [vmem:[#allocation24_spill] sm:$0xff]  ;;  %v2434_v8 = vld [vmem:[#allocation53_spill] sm:$0xff] }
 0x1eb   : > { %v1102_v31 = vadd.f32 %v1101_v0, %v1073_v32  ;;  %v1122_v2 = vadd.f32 %v1072_v43, %v1070_v36  ;;  %v1049_v0 = vmul.f32 %v2064_v30, %v2129_v5  ;;  %v1082_v30 = vmul.f32 %v1050_v19, %v2143_v17  ;;  %v860_v4 = vpop.f32.mrf.mxu1  ;;  %v2407_v5 = vld [vmem:[#allocation22_spill] sm:$0xff]  ;;  %v2414_v43 = vld [vmem:[#allocation48_spill] sm:$0xff] }
 0x1ec   : > { %v1057_v6 = vmul.f32 %v2407_v5, %v2406_v55  ;;  %v1088_v21 = vmul.f32 %v1056_v63, %v2411_v20  ;;  %v1059_v40 = vmul.f32 %v2413_v28, %v2412_v23  ;;  %v2422_v19 = vld [vmem:[#allocation46_spill] sm:$0xff]  ;;  %v2426_v39 = vld [vmem:[#allocation28_spill] sm:$0xff] }
 0x1ed   : > { %v1103_v26 = vadd.f32 %v1102_v31, %v1075_v9  ;;  %v1123_v3 = vadd.f32 %v1122_v2, %v1074_v11  ;;  %v1081_v24 = vmul.f32 %v1049_v0, %v2139_v14  ;;  %v2409_v14 = vld [vmem:[#allocation40_spill] sm:$0xff]  ;;  %v2415_v9 = vld [vmem:[#allocation43_spill] sm:$0xff]  ;;  %v2416_v31 = vld [vmem:[#allocation25_spill] sm:$0xff]  ;;  %v862_v16 = vpop.f32.mrf.mxu1 }
 0x1ee   : > { %v1058_v17 = vmul.f32 %v2410_v15, %v2409_v14  ;;  %v1089_v29 = vmul.f32 %v1057_v6, %v2414_v43  ;;  %v1060_v2 = vmul.f32 %v2416_v31, %v2415_v9  ;;  %v2432_v55 = vld [vmem:[#allocation52_spill] sm:$0xff]  ;;  %v2437_v20 = vld [vmem:[#allocation34_spill] sm:$0xff] }
 0x1ef   : > { %v1104_v36 = vadd.f32 %v1103_v26, %v1077_v58  ;;  %v1124_v32 = vadd.f32 %v1123_v3, %v1076_v61  ;;  %v2418_v58 = vld [vmem:[#allocation44_spill] sm:$0xff]  ;;  %v2419_v26 = vld [vmem:[#allocation26_spill] sm:$0xff] }
 0x1f0   : > { %v1090_v61 = vmul.f32 %v1058_v17, %v2417_v57  ;;  %v1061_v3 = vmul.f32 %v2419_v26, %v2418_v58  ;;  %v2436_v17 = vld [vmem:[#allocation55_spill] sm:$0xff] }
 0x1f1   : > { %v1105_v37 = vadd.f32 %v1104_v36, %v1079_v13  ;;  %v1125_v38 = vadd.f32 %v1124_v32, %v1078_v7  ;;  %v1091_v7 = vmul.f32 %v1059_v40, %v2420_v49  ;;  %v2421_v36 = vld [vmem:[#allocation33_spill] sm:$0xff]  ;;  %v1638_v49 = vmov 1966171168  }
 0x1f2   : > { %v1013_v32 = vrot.slane %v2421_v36, 4  ;;  %v1093_v44 = vmul.f32 %v1061_v3, %v2198_v18  ;;  %v2433_v18 = vld [vmem:[#allocation31_spill] sm:$0xff] }
 0x1f3   : > { %v1106_v45 = vadd.f32 %v1105_v37, %v1081_v24  ;;  %v1126_v47 = vadd.f32 %v1125_v38, %v1080_v33  ;;  %v2423_v33 = vld [vmem:[#allocation27_spill] sm:$0xff]  ;;  %v2424_v24 = vld [vmem:[#allocation56_spill] sm:$0xff]  ;;  %v1066_v5 = vmul.f32 %v2433_v18, %v2432_v55 }
 0x1f4   : > { %v1062_v34 = vmul.f32 %v2423_v33, %v2422_v19  ;;  %v1092_v37 = vmul.f32 %v1060_v2, %v2424_v24  ;;  %v2425_v38 = vld [vmem:[#allocation47_spill] sm:$0xff] }
 0x1f5   : > { %v1107_v54 = vadd.f32 %v1106_v45, %v1083_v35  ;;  %v1127_v56 = vadd.f32 %v1126_v47, %v1082_v30  ;;  %v1063_v30 = vmul.f32 %v2426_v39, %v2425_v38  ;;  %v2427_v47 = vld [vmem:[#allocation35_spill] sm:$0xff]  ;;  %v1098_v23 = vmul.f32 %v1066_v5, %v862_v16 }
 0x1f6   : > { %v1031_v41 = vrot.slane %v2427_v47, 4  ;;  %v1094_v53 = vmul.f32 %v1062_v34, %v2206_v25 }
 0x1f7   : > { %v1108_v10 = vadd.f32 %v1107_v54, %v1085_v46  ;;  %v1128_v12 = vadd.f32 %v1127_v56, %v1084_v48  ;;  %v2428_v48 = vld [vmem:[#allocation49_spill] sm:$0xff]  ;;  %v866_v46 = vpop.f32.mrf.mxu1  ;;  %v2430_v54 = vld [vmem:[#allocation50_spill] sm:$0xff]  ;;  %v1095_v62 = vmul.f32 %v1063_v30, %v854_v27 }
 0x1f8   : > { %v1064_v51 = vmul.f32 %v2429_v50, %v2428_v48  ;;  %v2431_v56 = vld [vmem:[#allocation30_spill] sm:$0xff]  ;;  %v1032_v25 = vadd.f32 %v1031_v41, %v2427_v47 }
 0x1f9   : > { %v1109_v11 = vadd.f32 %v1108_v10, %v1087_v59  ;;  %v1129_v22 = vadd.f32 %v1128_v12, %v1086_v1  ;;  %v1065_v60 = vmul.f32 %v2431_v56, %v2430_v54  ;;  %v1014_v1 = vadd.f32 %v1013_v32, %v2421_v36  ;;  %v2435_v59 = vld [vmem:[#allocation32_spill] sm:$0xff]  ;;  %v868_v27 = vpop.f32.mrf.mxu1 }
 0x1fa   : > { %v1096_v6 = vmul.f32 %v1064_v51, %v856_v42  ;;  %v1067_v10 = vmul.f32 %v2435_v59, %v2434_v8  ;;  %v1033_v9 = vrot.slane %v1032_v25, 2  ;;  %v1151_v36 = vlaneseq }
 0x1fb   : > { %v1110_v0 = vadd.f32 %v1109_v11, %v1089_v29  ;;  %v1130_v13 = vadd.f32 %v1129_v22, %v1088_v21  ;;  %v1097_v12 = vmul.f32 %v1065_v60, %v860_v4  ;;  %v1068_v21 = vmul.f32 %v2437_v20, %v2436_v17 }
 0x1fc   : > { %v1099_v28 = vmul.f32 %v1067_v10, %v866_v46  ;;  %v1015_v29 = vrot.slane %v1014_v1, 2  ;;  %v1034_v58 = vadd.f32 %v1033_v9, %v1032_v25  ;;  %v1152_v39 = vshrl.u32 %v1151_v36, 7 }
 0x1fd   : > { %v1111_v35 = vadd.f32 %v1110_v0, %v1091_v7  ;;  %v1131_v45 = vadd.f32 %v1130_v13, %v1090_v61  ;;  %v1100_v11 = vmul.f32 %v1068_v21, %v868_v27  ;;  %v1149_v7 = vunpack.c.l.s4 %v1638_v49 }
 0x1fe   : > { %v1016_v4 = vadd.f32 %v1015_v29, %v1014_v1  ;;  %v1035_v32 = vrot.slane %v1034_v58, 1  ;;  %vm1165_vm0 = vcmp.lt.s32.totalorder %v1151_v36, 256 }
 0x1ff   : > { %v1112_v63 = vadd.f32 %v1111_v35, %v1093_v44  ;;  %v1132_v52 = vadd.f32 %v1131_v45, %v1092_v37  ;;  %v1150_v34 = vunpack.c.0.s8 %v1149_v7 }
 0x200   : > { %v1017_v16 = vrot.slane %v1016_v4, 1  ;;  %v1036_v30 = vadd.f32 %v1035_v32, %v1034_v58 }
 0x201   : > { %v1113_v14 = vadd.f32 %v1112_v63, %v1095_v62  ;;  %v1133_v15 = vadd.f32 %v1132_v52, %v1094_v53  ;;  %v1153_v47 = vsub.s32 %v1150_v34, %v1152_v39 }
 0x202   : > { %v1018_v24 = vadd.f32 %v1017_v16, %v1016_v4 }
 0x203   : > { %v1134_v40 = vadd.f32 %v1133_v15, %v1096_v6  ;;  %v1114_v43 = vadd.f32 %v1113_v14, %v1097_v12 }
 0x205   : > { %v1115_v22 = vadd.f32 %v1114_v43, %v1099_v28  ;;  %v1135_v42 = vadd.f32 %v1134_v40, %v1098_v23 }
 0x207   : > { %v1116_v31 = vrot.slane %v1115_v22, 4  ;;  %v1136_v2 = vadd.f32 %v1135_v42, %v1100_v11 }
 0x209   : > { %v1117_v57 = vadd.f32 %v1116_v31, %v1115_v22  ;;  %v1137_v61 = vrot.slane %v1136_v2, 4 }
 0x20b   : > { %v1118_v26 = vrot.slane %v1117_v57, 2  ;;  %v1138_v3 = vadd.f32 %v1137_v61, %v1136_v2 }
 0x20d   : > { %v1119_v0 = vadd.f32 %v1118_v26, %v1117_v57  ;;  %v1139_v13 = vrot.slane %v1138_v3, 2 }
 0x20f   : > { %v1120_v19 = vrot.slane %v1119_v0, 1  ;;  %v1140_v33 = vadd.f32 %v1139_v13, %v1138_v3 }
 0x211   : > { %v1121_v37 = vadd.f32 %v1120_v19, %v1119_v0  ;;  %v1141_v38 = vrot.slane %v1140_v33, 1 }
 0x213   : > { %v1142_v44 = vadd.f32 %v1141_v38, %v1140_v33  ;;  %v1143_v35 = vadd.f32 %v1121_v37, %v1018_v24 }
 0x215   : > { %v1144_v45 = vadd.f32 %v1142_v44, %v1036_v30 }
 0x217   : > { %v1147_v41 = vcombine.low %v1143_v35, %v1144_v45 }
 0x219   : > { %v1154_v48 = vrot.slane %v1147_v41, %v1153_v47 }
 0x21b   : > { %v1161_v50 = vrot.slane %v1154_v48, %v1153_v47 }
 0x21d   : > { %1167 = vst.msk [vmem:[%s334_s1] sm:$0x3] %vm1165_vm0, %v1161_v50 }
 0x21e   : > { %1566 = shalt.err (!%p1563_p3)
}
 0x21f   : > { %s1567_s6 = scalar_lea.hbm %s1181_s27, 32  ;;  %s1571_s29 = scalar_lea.hbm %s2438_s14, 64 }
 0x220   : > { %p1568_p13 = scmp.ne.s32.totalorder %s1181_s27, %s1567_s6  ;;  %p1572_p7 = scmp.lt.s32.totalorder %s1181_s27, %s2438_s14 }
 0x221   : > { %p1573_p6 = scmp.lt.s32.totalorder %s1571_s29, %s1567_s6 }
 0x222   : > { %p1569_p2 = pnand %p1568_p13, %p2439_p12 }
 0x223   : > { %p1574_p4 = por %p1573_p6, %p1572_p7 }
 0x224   : > { %p1570_p8 = pneg %p1569_p2 }
 0x226   : > { %p1575_p11 = pnand %p1574_p4, %p1570_p8 }
 0x228   : > { %1578 = shalt.err (!%p1575_p11)
}
 0x229   : > { %1376 = dma.vmem_to_hbm [thread:$0]  (%p2439_p12), %s1184_s26, 32, %s1181_s27, %s1169_s28  }
 0x22a PF: > { %s2440_s5 = sld [smem:[#allocation15_spill]] }
 0x22b   : > { %s2441_s17 = sld [smem:[#allocation19_spill]] }
 0x22c   : > { %s2442_s18 = sld [smem:[#allocation16_spill]] }
 0x230   : > { %s1195_s22 = sand.u32 1, %s2440_s5  }
 0x231   : > { %p2443_p1 = scmp.ne.s32.totalorder %s2441_s17, 0  ;;  %s1196_s12 = scalar_lea.sflag [#allocation4], %s1195_s22 }
 0x232   : > { %p2444_p5 = scmp.ge.s32.totalorder %s2442_s18, 2 }
 0x234   : > { %p1393_p10 = pnand %p2444_p5, %p2443_p1 }
 0x236   : > { %p1394_p9 = pneg %p1393_p10 }
 0x238   : > { %1608 = dma.done.wait (%p1394_p9), %s1196_s12, 32  }
 0x239   : > { %1610 = vsyncadd (%p1394_p9), %s1196_s12, 4294967264  ;;  %s2445_s21 = sld [smem:[#allocation17_spill]]  ;;  %s2447_s18 = smov %s1617_s19 }
 0x23a   : > { %s2446_s16 = sld [smem:[#allocation18_spill]]  ;;  %s2448_s19 = smov %s1621_s20 }
 0x23f   : > { %p22_p0 = scmp.ge.s32.totalorder %s2445_s21, 4  }
 0x240   : > { %s2449_s20 = smov %s2446_s16 }
 0x241   :  { %24 = sbr.rel (!%p22_p0) target bundleno = 11 (0xb), region = 113 }
 0x246   :  { %1201 = vsyncpa [#allocation3], 1 }
 0x247   :  { %1203 = vsyncpa [#allocation3 + $0x1], 1 }
 0x248   :  { %1204 = vsyncpa [#allocation6], 1 }
 0x249   :  { %1206 = vsyncpa [#allocation6 + $0x1], 1 }
 0x24a   :  { %1207 = vsyncpa [#allocation9], 1 }
 0x24b   :  { %1208 = vsyncpa [#allocation4], 1 }
 0x24c   :  { %1210 = vsyncpa [#allocation4 + $0x1], 1 }

</bundles_post_ra>
